<compile_context>
chip_gen: v7x
topology: tpu7x:2x2x1
jax: 0.10.0
libtpu: 0.0.40
codegen_flags: <defaults>
</compile_context>

<pallas_src>
import jax
import jax.numpy as jnp
from jax.experimental import pallas as pl
from jax.experimental.pallas import tpu as pltpu


# --------------------------------------------------------------------------- #
# Fused kernel: conv1+ReLU -> conv2+ReLU -> biLSTM(last step) -> MLP head
# --------------------------------------------------------------------------- #

def fused_forward_kernel(
    x_ref,                                              # (B, T, Din)
    c1w_ref, c1b_ref,                                   # (K, Din, Cc), (1, Cc)
    c2w_ref, c2b_ref,                                   # (K, Cc, Cc),  (1, Cc)
    wih_f_ref, whh_f_ref, b_f_ref,                      # (Cc,4H), (H,4H), (1,4H)
    wih_b_ref, b_b_ref,                                 # (Cc,4H), (1,4H)
    w1_ref, b1_ref, w2_ref, b2_ref, w3_ref, b3_ref,     # MLP head
    out_ref,                                            # (B, out_dim)
    feat_ref,                                           # (B, 2H)
    pad1_ref, pad2_ref,                                 # VMEM scratch (padded x)
):
    B, T, Din = x_ref.shape
    K = c1w_ref.shape[0]
    Cc = c1w_ref.shape[2]
    H = whh_f_ref.shape[0]
    pad_l = (K - 1) // 2                                # PyTorch 'same' left pad
    f32 = jnp.float32

    # ------------------ conv1d #1 ('same') + ReLU ------------------------- #
    pad1_ref[...] = jnp.zeros_like(pad1_ref)
    pad1_ref[:, pad_l:pad_l + T, :] = x_ref[...]
    xp1 = pad1_ref[...]                                 # (B, T+K-1, Din)
    h1 = jnp.zeros((B * T, Cc), f32) + c1b_ref[...]
    for k in range(K):                                  # K static -> unrolled
        h1 = h1 + jnp.dot(xp1[:, k:k + T, :].reshape(B * T, Din), c1w_ref[k],
                          preferred_element_type=f32)
    h1 = jnp.maximum(h1, 0.0)                           # (B*T, Cc)

    # ------------------ conv1d #2 ('same') + ReLU ------------------------- #
    pad2_ref[...] = jnp.zeros_like(pad2_ref)
    pad2_ref[:, pad_l:pad_l + T, :] = h1.reshape(B, T, Cc)
    xp2 = pad2_ref[...]                                 # (B, T+K-1, Cc)
    h2 = jnp.zeros((B * T, Cc), f32) + c2b_ref[...]
    for k in range(K):
        h2 = h2 + jnp.dot(xp2[:, k:k + T, :].reshape(B * T, Cc), c2w_ref[k],
                          preferred_element_type=f32)
    h2 = jnp.maximum(h2, 0.0)                           # (B*T, Cc)

    # ------------------ bidirectional LSTM, last time step only ----------- #
    # Forward direction: full recurrence, keep only final h.
    # Input projection for all T steps in one matmul (off the serial path).
    gx_f = (jnp.dot(h2, wih_f_ref[...], preferred_element_type=f32)
            + b_f_ref[...]).reshape(B, T, 4 * H)        # (B, T, 4H)
    whh_f = whh_f_ref[...]

    h = jnp.zeros((B, H), f32)
    c = jnp.zeros((B, H), f32)
    for t in range(T):                                  # T static -> unrolled
        gates = gx_f[:, t, :] + jnp.dot(h, whh_f, preferred_element_type=f32)
        sg = jax.nn.sigmoid(gates)                      # full 4H-wide EUP op
        th = jnp.tanh(gates)                            # full 4H-wide EUP op
        i_g = sg[:, 0 * H:1 * H]                        # PyTorch gate order
        f_g = sg[:, 1 * H:2 * H]                        # i, f, g, o
        g_g = th[:, 2 * H:3 * H]
        o_g = sg[:, 3 * H:4 * H]
        c = f_g * c + i_g * g_g
        h = o_g * jnp.tanh(c)
    h_fwd = h                                           # (B, H)

    # Backward direction at t = T-1: exactly one cell step from zero state,
    # so the W_hh and f*c0 terms vanish.
    x_last = h2.reshape(B, T, Cc)[:, T - 1, :]          # (B, Cc)
    gates_b = (jnp.dot(x_last, wih_b_ref[...], preferred_element_type=f32)
               + b_b_ref[...])                          # (B, 4H)
    sg_b = jax.nn.sigmoid(gates_b)
    th_b = jnp.tanh(gates_b)
    c_b = sg_b[:, 0 * H:1 * H] * th_b[:, 2 * H:3 * H]   # i * g   (f*c0 = 0)
    h_bwd = sg_b[:, 3 * H:4 * H] * jnp.tanh(c_b)        # (B, H)

    # lstm_features = concat([h_fwd, h_bwd], -1), written directly.
    feat_ref[:, 0:H] = h_fwd
    feat_ref[:, H:2 * H] = h_bwd

    # ------------------ MLP head ------------------------------------------ #
    w1 = w1_ref[...]
    d1 = jnp.maximum(
        jnp.dot(h_fwd, w1[0:H, :], preferred_element_type=f32)
        + jnp.dot(h_bwd, w1[H:2 * H, :], preferred_element_type=f32)
        + b1_ref[...], 0.0)
    d2 = jnp.maximum(
        jnp.dot(d1, w2_ref[...], preferred_element_type=f32) + b2_ref[...], 0.0)
    out_ref[...] = (jnp.dot(d2, w3_ref[...], preferred_element_type=f32)
                    + b3_ref[...])


# --------------------------------------------------------------------------- #
# Wrapper: one pallas_call for the whole forward pass
# --------------------------------------------------------------------------- #

_VMEM = pltpu.MemorySpace.VMEM


def complex_lstm_forward(x, p):
    B, T, Din = x.shape
    K, _, Cc = p["conv1_w"].shape
    H = p["whh_f"].shape[0]
    out_dim = p["w3"].shape[1]

    out, feat = pl.pallas_call(
        fused_forward_kernel,
        out_shape=(jax.ShapeDtypeStruct((B, out_dim), jnp.float32),
                   jax.ShapeDtypeStruct((B, 2 * H), jnp.float32)),
        in_specs=[pl.BlockSpec(memory_space=_VMEM)] * 16,
        out_specs=(pl.BlockSpec(memory_space=_VMEM),
                   pl.BlockSpec(memory_space=_VMEM)),
        scratch_shapes=[
            pltpu.VMEM((B, T + K - 1, Din), jnp.float32),   # padded conv1 input
            pltpu.VMEM((B, T + K - 1, Cc), jnp.float32),    # padded conv2 input
        ],
    )(
        x,
        p["conv1_w"], p["conv1_b"],
        p["conv2_w"], p["conv2_b"],
        p["wih_f"], p["whh_f"], p["b_f"],
        p["wih_b"], p["b_b"],                 # whh_b not needed (zero h0, 1 step)
        p["w1"], p["b1"], p["w2"], p["b2"], p["w3"], p["b3"],
    )
    return out, feat


forward_jit = jax.jit(complex_lstm_forward)


# --------------------------------------------------------------------------- #
# Pure-JAX reference (full bidirectional sequence, then slice last step)
# --------------------------------------------------------------------------- #

def reference_forward(x, p):
    def conv(xin, w, b):
        K = w.shape[0]
        T = xin.shape[1]
        pad_l = (K - 1) // 2
        xp = jnp.pad(xin, ((0, 0), (pad_l, (K - 1) - pad_l), (0, 0)))
        y = jnp.zeros(xin.shape[:2] + (w.shape[2],), jnp.float32) + b
        for k in range(K):
            y = y + jnp.einsum("btc,cd->btd", xp[:, k:k + T, :], w[k])
        return jax.nn.relu(y)

    h = conv(x, p["conv1_w"], p["conv1_b"])
    h = conv(h, p["conv2_w"], p["conv2_b"])
    B, T, _ = h.shape
    H = p["whh_f"].shape[0]

    def cell(xt, hc, wih, whh, b):
        hp, cp = hc
        g = xt @ wih + hp @ whh + b
        i = jax.nn.sigmoid(g[:, 0 * H:1 * H])
        f = jax.nn.sigmoid(g[:, 1 * H:2 * H])
        gg = jnp.tanh(g[:, 2 * H:3 * H])
        o = jax.nn.sigmoid(g[:, 3 * H:4 * H])
        c = f * cp + i * gg
        return o * jnp.tanh(c), c

    hf = jnp.zeros((B, H)); cf = jnp.zeros((B, H))
    fwd = []
    for t in range(T):
        hf, cf = cell(h[:, t, :], (hf, cf), p["wih_f"], p["whh_f"], p["b_f"])
        fwd.append(hf)
    hb = jnp.zeros((B, H)); cb = jnp.zeros((B, H))
    bwd = [None] * T
    for t in range(T - 1, -1, -1):
        hb, cb = cell(h[:, t, :], (hb, cb), p["wih_b"], p["whh_b"], p["b_b"])
        bwd[t] = hb
    seq = jnp.concatenate([jnp.stack(fwd, 1), jnp.stack(bwd, 1)], axis=-1)
    feat = seq[:, -1, :]
    d1 = jax.nn.relu(feat @ p["w1"] + p["b1"])
    d2 = jax.nn.relu(d1 @ p["w2"] + p["b2"])
    return d2 @ p["w3"] + p["b3"], feat


# --------------------------------------------------------------------------- #
# Deterministic parameter construction + example run
# --------------------------------------------------------------------------- #

def init_params(key, input_dim, conv_dim, conv_k, lstm_dim, dense_dim, output_dim):
    ks = jax.random.split(key, 17)
    s = 0.1

    def nrm(k, shape):
        return (s * jax.random.normal(k, shape, jnp.float32)).astype(jnp.float32)

    H4 = 4 * lstm_dim
    return dict(
        conv1_w=nrm(ks[0], (conv_k, input_dim, conv_dim)),
        conv1_b=nrm(ks[1], (1, conv_dim)),
        conv2_w=nrm(ks[2], (conv_k, conv_dim, conv_dim)),
        conv2_b=nrm(ks[3], (1, conv_dim)),
        # LSTM weights pre-transposed: (in, 4H) / (H, 4H); combined ih+hh bias.
        wih_f=nrm(ks[4], (conv_dim, H4)),
        whh_f=nrm(ks[5], (lstm_dim, H4)),
        b_f=nrm(ks[6], (1, H4)),
        wih_b=nrm(ks[7], (conv_dim, H4)),
        whh_b=nrm(ks[8], (lstm_dim, H4)),   # only used by the reference
        b_b=nrm(ks[9], (1, H4)),
        # Linear weights stored as (in, out) = PyTorch weight.T
        w1=nrm(ks[10], (2 * lstm_dim, dense_dim)),
        b1=nrm(ks[11], (1, dense_dim)),
        w2=nrm(ks[12], (dense_dim, dense_dim)),
        b2=nrm(ks[13], (1, dense_dim)),
        w3=nrm(ks[14], (dense_dim, output_dim)),
        b3=nrm(ks[15], (1, output_dim)),
    )


if __name__ == "__main__":
    # Small shapes: batch=2, seq=8, input_dim=4, conv_dim=16, K=3,
    # lstm_dim=32, dense_dim=32, output_dim=4, activations='relu'.
    B, T = 2, 8
    input_dim, conv_dim, conv_k = 4, 16, 3
    lstm_dim, dense_dim, output_dim = 32, 32, 4

    key = jax.random.PRNGKey(0)
    k_params, k_x = jax.random.split(key)
    params = init_params(k_params, input_dim, conv_dim, conv_k,
                         lstm_dim, dense_dim, output_dim)

    # PyTorch module input: (B, T, input_dim)
    x = jax.random.normal(k_x, (B, T, input_dim), jnp.float32)

    out, lstm_features = forward_jit(x, params)
    jax.block_until_ready((out, lstm_features))

    assert out.shape == (B, output_dim)
    assert lstm_features.shape == (B, 2 * lstm_dim)

    # Numerical check against a pure-JAX reference of the PyTorch forward.
    out_ref, feat_ref = reference_forward(x, params)
    assert bool(jnp.allclose(out, out_ref, atol=2e-3, rtol=2e-2)), "dense out mismatch"
    assert bool(jnp.allclose(lstm_features, feat_ref, atol=2e-3, rtol=2e-2)), \
        "lstm_features mismatch"

    print("KERNEL_OK")
</pallas_src>

<mosaic_0001>
module attributes {stable_mosaic.version = 11 : i64} {
  func.func @fused_forward_kernel(%arg0: memref<2x8x4xf32, #tpu.memory_space<vmem>>, %arg1: memref<3x4x16xf32, #tpu.memory_space<vmem>>, %arg2: memref<1x16xf32, #tpu.memory_space<vmem>>, %arg3: memref<3x16x16xf32, #tpu.memory_space<vmem>>, %arg4: memref<1x16xf32, #tpu.memory_space<vmem>>, %arg5: memref<16x128xf32, #tpu.memory_space<vmem>>, %arg6: memref<32x128xf32, #tpu.memory_space<vmem>>, %arg7: memref<1x128xf32, #tpu.memory_space<vmem>>, %arg8: memref<16x128xf32, #tpu.memory_space<vmem>>, %arg9: memref<1x128xf32, #tpu.memory_space<vmem>>, %arg10: memref<64x32xf32, #tpu.memory_space<vmem>>, %arg11: memref<1x32xf32, #tpu.memory_space<vmem>>, %arg12: memref<32x32xf32, #tpu.memory_space<vmem>>, %arg13: memref<1x32xf32, #tpu.memory_space<vmem>>, %arg14: memref<32x4xf32, #tpu.memory_space<vmem>>, %arg15: memref<1x4xf32, #tpu.memory_space<vmem>>, %arg16: memref<2x4xf32, #tpu.memory_space<vmem>>, %arg17: memref<2x64xf32, #tpu.memory_space<vmem>>, %arg18: memref<2x10x4xf32, #tpu.memory_space<vmem>>, %arg19: memref<2x10x16xf32, #tpu.memory_space<vmem>>) attributes {dimension_semantics = [], scalar_prefetch = 0 : i64, scratch_operands = 2 : i64, tpu.core_type = #tpu.core_type<tc>} {
    %cst = arith.constant 0.000000e+00 : f32
    %0 = vector.broadcast %cst : f32 to vector<2x10x4xf32>
    %c0 = arith.constant 0 : index
    %c0_0 = arith.constant 0 : index
    %c0_1 = arith.constant 0 : index
    %1 = vector.load %arg18[%c0, %c0_0, %c0_1] : memref<2x10x4xf32, #tpu.memory_space<vmem>>, vector<2x10x4xf32>
    tpu.vector_store %arg18[%c0, %c0_0, %c0_1], %0 {strides = array<i32>} : memref<2x10x4xf32, #tpu.memory_space<vmem>>, vector<2x10x4xf32>,
    %c0_2 = arith.constant 0 : index
    %c0_3 = arith.constant 0 : index
    %c0_4 = arith.constant 0 : index
    %2 = vector.load %arg0[%c0_2, %c0_3, %c0_4] : memref<2x8x4xf32, #tpu.memory_space<vmem>>, vector<2x8x4xf32>
    %c0_5 = arith.constant 0 : index
    %c1 = arith.constant 1 : index
    %c0_6 = arith.constant 0 : index
    %3 = vector.load %arg18[%c0_5, %c1, %c0_6] : memref<2x10x4xf32, #tpu.memory_space<vmem>>, vector<2x8x4xf32>
    tpu.vector_store %arg18[%c0_5, %c1, %c0_6], %2 {strides = array<i32>} : memref<2x10x4xf32, #tpu.memory_space<vmem>>, vector<2x8x4xf32>,
    %c0_7 = arith.constant 0 : index
    %c0_8 = arith.constant 0 : index
    %c0_9 = arith.constant 0 : index
    %4 = vector.load %arg18[%c0_7, %c0_8, %c0_9] : memref<2x10x4xf32, #tpu.memory_space<vmem>>, vector<2x10x4xf32>
    %cst_10 = arith.constant 0.000000e+00 : f32
    %5 = vector.broadcast %cst_10 : f32 to vector<16x16xf32>
    %c0_11 = arith.constant 0 : index
    %c0_12 = arith.constant 0 : index
    %6 = vector.load %arg2[%c0_11, %c0_12] : memref<1x16xf32, #tpu.memory_space<vmem>>, vector<1x16xf32>
    %7 = vector.broadcast %6 : vector<1x16xf32> to vector<16x16xf32>
    %8 = arith.addf %5, %7 : vector<16x16xf32>
    %9 = vector.extract_strided_slice %4 {offsets = [0, 0, 0], sizes = [2, 8, 4], strides = [1, 1, 1]} : vector<2x10x4xf32> to vector<2x8x4xf32>
    %10 = vector.shape_cast %9 : vector<2x8x4xf32> to vector<16x4xf32>
    %c0_13 = arith.constant 0 : index
    %c0_14 = arith.constant 0 : index
    %c0_15 = arith.constant 0 : index
    %11 = vector.load %arg1[%c0_13, %c0_14, %c0_15] : memref<3x4x16xf32, #tpu.memory_space<vmem>>, vector<1x4x16xf32>
    %12 = vector.shape_cast %11 : vector<1x4x16xf32> to vector<4x16xf32>
    %cst_16 = arith.constant dense<0.000000e+00> : vector<16x16xf32>
    %13 = tpu.matmul %10, %12, %cst_16 {dimension_numbers = #tpu.dot_dimension_numbers<[1], [0], [0], [1], [0, 0, 1, 1], [], []>} : vector<16x4xf32>, vector<4x16xf32>, vector<16x16xf32> -> vector<16x16xf32>
    %14 = arith.addf %8, %13 : vector<16x16xf32>
    %15 = vector.extract_strided_slice %4 {offsets = [0, 1, 0], sizes = [2, 8, 4], strides = [1, 1, 1]} : vector<2x10x4xf32> to vector<2x8x4xf32>
    %16 = vector.shape_cast %15 : vector<2x8x4xf32> to vector<16x4xf32>
    %c1_17 = arith.constant 1 : index
    %c0_18 = arith.constant 0 : index
    %c0_19 = arith.constant 0 : index
    %17 = vector.load %arg1[%c1_17, %c0_18, %c0_19] : memref<3x4x16xf32, #tpu.memory_space<vmem>>, vector<1x4x16xf32>
    %18 = vector.shape_cast %17 : vector<1x4x16xf32> to vector<4x16xf32>
    %cst_20 = arith.constant dense<0.000000e+00> : vector<16x16xf32>
    %19 = tpu.matmul %16, %18, %cst_20 {dimension_numbers = #tpu.dot_dimension_numbers<[1], [0], [0], [1], [0, 0, 1, 1], [], []>} : vector<16x4xf32>, vector<4x16xf32>, vector<16x16xf32> -> vector<16x16xf32>
    %20 = arith.addf %14, %19 : vector<16x16xf32>
    %21 = vector.extract_strided_slice %4 {offsets = [0, 2, 0], sizes = [2, 8, 4], strides = [1, 1, 1]} : vector<2x10x4xf32> to vector<2x8x4xf32>
    %22 = vector.shape_cast %21 : vector<2x8x4xf32> to vector<16x4xf32>
    %c2 = arith.constant 2 : index
    %c0_21 = arith.constant 0 : index
    %c0_22 = arith.constant 0 : index
    %23 = vector.load %arg1[%c2, %c0_21, %c0_22] : memref<3x4x16xf32, #tpu.memory_space<vmem>>, vector<1x4x16xf32>
    %24 = vector.shape_cast %23 : vector<1x4x16xf32> to vector<4x16xf32>
    %cst_23 = arith.constant dense<0.000000e+00> : vector<16x16xf32>
    %25 = tpu.matmul %22, %24, %cst_23 {dimension_numbers = #tpu.dot_dimension_numbers<[1], [0], [0], [1], [0, 0, 1, 1], [], []>} : vector<16x4xf32>, vector<4x16xf32>, vector<16x16xf32> -> vector<16x16xf32>
    %26 = arith.addf %20, %25 : vector<16x16xf32>
    %cst_24 = arith.constant 0.000000e+00 : f32
    %27 = vector.broadcast %cst_24 : f32 to vector<16x16xf32>
    %28 = arith.maximumf %26, %27 : vector<16x16xf32>
    %cst_25 = arith.constant 0.000000e+00 : f32
    %29 = vector.broadcast %cst_25 : f32 to vector<2x10x16xf32>
    %c0_26 = arith.constant 0 : index
    %c0_27 = arith.constant 0 : index
    %c0_28 = arith.constant 0 : index
    %30 = vector.load %arg19[%c0_26, %c0_27, %c0_28] : memref<2x10x16xf32, #tpu.memory_space<vmem>>, vector<2x10x16xf32>
    tpu.vector_store %arg19[%c0_26, %c0_27, %c0_28], %29 {strides = array<i32>} : memref<2x10x16xf32, #tpu.memory_space<vmem>>, vector<2x10x16xf32>,
    %31 = vector.shape_cast %28 : vector<16x16xf32> to vector<2x8x16xf32>
    %c0_29 = arith.constant 0 : index
    %c1_30 = arith.constant 1 : index
    %c0_31 = arith.constant 0 : index
    %32 = vector.load %arg19[%c0_29, %c1_30, %c0_31] : memref<2x10x16xf32, #tpu.memory_space<vmem>>, vector<2x8x16xf32>
    tpu.vector_store %arg19[%c0_29, %c1_30, %c0_31], %31 {strides = array<i32>} : memref<2x10x16xf32, #tpu.memory_space<vmem>>, vector<2x8x16xf32>,
    %c0_32 = arith.constant 0 : index
    %c0_33 = arith.constant 0 : index
    %c0_34 = arith.constant 0 : index
    %33 = vector.load %arg19[%c0_32, %c0_33, %c0_34] : memref<2x10x16xf32, #tpu.memory_space<vmem>>, vector<2x10x16xf32>
    %cst_35 = arith.constant 0.000000e+00 : f32
    %34 = vector.broadcast %cst_35 : f32 to vector<16x16xf32>
    %c0_36 = arith.constant 0 : index
    %c0_37 = arith.constant 0 : index
    %35 = vector.load %arg4[%c0_36, %c0_37] : memref<1x16xf32, #tpu.memory_space<vmem>>, vector<1x16xf32>
    %36 = vector.broadcast %35 : vector<1x16xf32> to vector<16x16xf32>
    %37 = arith.addf %34, %36 : vector<16x16xf32>
    %38 = vector.extract_strided_slice %33 {offsets = [0, 0, 0], sizes = [2, 8, 16], strides = [1, 1, 1]} : vector<2x10x16xf32> to vector<2x8x16xf32>
    %39 = vector.shape_cast %38 : vector<2x8x16xf32> to vector<16x16xf32>
    %c0_38 = arith.constant 0 : index
    %c0_39 = arith.constant 0 : index
    %c0_40 = arith.constant 0 : index
    %40 = vector.load %arg3[%c0_38, %c0_39, %c0_40] : memref<3x16x16xf32, #tpu.memory_space<vmem>>, vector<1x16x16xf32>
    %41 = vector.shape_cast %40 : vector<1x16x16xf32> to vector<16x16xf32>
    %cst_41 = arith.constant dense<0.000000e+00> : vector<16x16xf32>
    %42 = tpu.matmul %39, %41, %cst_41 {dimension_numbers = #tpu.dot_dimension_numbers<[1], [0], [0], [1], [0, 0, 1, 1], [], []>} : vector<16x16xf32>, vector<16x16xf32>, vector<16x16xf32> -> vector<16x16xf32>
    %43 = arith.addf %37, %42 : vector<16x16xf32>
    %44 = vector.extract_strided_slice %33 {offsets = [0, 1, 0], sizes = [2, 8, 16], strides = [1, 1, 1]} : vector<2x10x16xf32> to vector<2x8x16xf32>
    %45 = vector.shape_cast %44 : vector<2x8x16xf32> to vector<16x16xf32>
    %c1_42 = arith.constant 1 : index
    %c0_43 = arith.constant 0 : index
    %c0_44 = arith.constant 0 : index
    %46 = vector.load %arg3[%c1_42, %c0_43, %c0_44] : memref<3x16x16xf32, #tpu.memory_space<vmem>>, vector<1x16x16xf32>
    %47 = vector.shape_cast %46 : vector<1x16x16xf32> to vector<16x16xf32>
    %cst_45 = arith.constant dense<0.000000e+00> : vector<16x16xf32>
    %48 = tpu.matmul %45, %47, %cst_45 {dimension_numbers = #tpu.dot_dimension_numbers<[1], [0], [0], [1], [0, 0, 1, 1], [], []>} : vector<16x16xf32>, vector<16x16xf32>, vector<16x16xf32> -> vector<16x16xf32>
    %49 = arith.addf %43, %48 : vector<16x16xf32>
    %50 = vector.extract_strided_slice %33 {offsets = [0, 2, 0], sizes = [2, 8, 16], strides = [1, 1, 1]} : vector<2x10x16xf32> to vector<2x8x16xf32>
    %51 = vector.shape_cast %50 : vector<2x8x16xf32> to vector<16x16xf32>
    %c2_46 = arith.constant 2 : index
    %c0_47 = arith.constant 0 : index
    %c0_48 = arith.constant 0 : index
    %52 = vector.load %arg3[%c2_46, %c0_47, %c0_48] : memref<3x16x16xf32, #tpu.memory_space<vmem>>, vector<1x16x16xf32>
    %53 = vector.shape_cast %52 : vector<1x16x16xf32> to vector<16x16xf32>
    %cst_49 = arith.constant dense<0.000000e+00> : vector<16x16xf32>
    %54 = tpu.matmul %51, %53, %cst_49 {dimension_numbers = #tpu.dot_dimension_numbers<[1], [0], [0], [1], [0, 0, 1, 1], [], []>} : vector<16x16xf32>, vector<16x16xf32>, vector<16x16xf32> -> vector<16x16xf32>
    %55 = arith.addf %49, %54 : vector<16x16xf32>
    %cst_50 = arith.constant 0.000000e+00 : f32
    %56 = vector.broadcast %cst_50 : f32 to vector<16x16xf32>
    %57 = arith.maximumf %55, %56 : vector<16x16xf32>
    %c0_51 = arith.constant 0 : index
    %c0_52 = arith.constant 0 : index
    %58 = vector.load %arg5[%c0_51, %c0_52] : memref<16x128xf32, #tpu.memory_space<vmem>>, vector<16x128xf32>
    %cst_53 = arith.constant dense<0.000000e+00> : vector<16x128xf32>
    %59 = tpu.matmul %57, %58, %cst_53 {dimension_numbers = #tpu.dot_dimension_numbers<[1], [0], [0], [1], [0, 0, 1, 1], [], []>} : vector<16x16xf32>, vector<16x128xf32>, vector<16x128xf32> -> vector<16x128xf32>
    %c0_54 = arith.constant 0 : index
    %c0_55 = arith.constant 0 : index
    %60 = vector.load %arg7[%c0_54, %c0_55] : memref<1x128xf32, #tpu.memory_space<vmem>>, vector<1x128xf32>
    %61 = vector.broadcast %60 : vector<1x128xf32> to vector<16x128xf32>
    %62 = arith.addf %59, %61 : vector<16x128xf32>
    %63 = vector.shape_cast %62 : vector<16x128xf32> to vector<2x8x128xf32>
    %c0_56 = arith.constant 0 : index
    %c0_57 = arith.constant 0 : index
    %64 = vector.load %arg6[%c0_56, %c0_57] : memref<32x128xf32, #tpu.memory_space<vmem>>, vector<32x128xf32>
    %cst_58 = arith.constant 0.000000e+00 : f32
    %65 = vector.broadcast %cst_58 : f32 to vector<2x32xf32>
    %cst_59 = arith.constant 0.000000e+00 : f32
    %66 = vector.broadcast %cst_59 : f32 to vector<2x32xf32>
    %67 = vector.extract_strided_slice %63 {offsets = [0, 0, 0], sizes = [2, 1, 128], strides = [1, 1, 1]} : vector<2x8x128xf32> to vector<2x1x128xf32>
    %68 = vector.shape_cast %67 : vector<2x1x128xf32> to vector<2x128xf32>
    %cst_60 = arith.constant dense<0.000000e+00> : vector<2x128xf32>
    %69 = tpu.matmul %65, %64, %cst_60 {dimension_numbers = #tpu.dot_dimension_numbers<[1], [0], [0], [1], [0, 0, 1, 1], [], []>} : vector<2x32xf32>, vector<32x128xf32>, vector<2x128xf32> -> vector<2x128xf32>
    %70 = arith.addf %68, %69 : vector<2x128xf32>
    %71 = arith.negf %70 : vector<2x128xf32>
    %72 = math.exp %71 : vector<2x128xf32>
    %cst_61 = arith.constant 1.000000e+00 : f32
    %73 = vector.broadcast %cst_61 : f32 to vector<2x128xf32>
    %74 = arith.addf %73, %72 : vector<2x128xf32>
    %75 = arith.divf %73, %74 : vector<2x128xf32>
    %76 = math.tanh %70 : vector<2x128xf32>
    %77 = vector.extract_strided_slice %75 {offsets = [0, 0], sizes = [2, 32], strides = [1, 1]} : vector<2x128xf32> to vector<2x32xf32>
    %78 = vector.extract_strided_slice %75 {offsets = [0, 32], sizes = [2, 32], strides = [1, 1]} : vector<2x128xf32> to vector<2x32xf32>
    %79 = vector.extract_strided_slice %76 {offsets = [0, 64], sizes = [2, 32], strides = [1, 1]} : vector<2x128xf32> to vector<2x32xf32>
    %80 = vector.extract_strided_slice %75 {offsets = [0, 96], sizes = [2, 32], strides = [1, 1]} : vector<2x128xf32> to vector<2x32xf32>
    %81 = arith.mulf %78, %66 : vector<2x32xf32>
    %82 = arith.mulf %77, %79 : vector<2x32xf32>
    %83 = arith.addf %81, %82 : vector<2x32xf32>
    %84 = math.tanh %83 : vector<2x32xf32>
    %85 = arith.mulf %80, %84 : vector<2x32xf32>
    %86 = vector.extract_strided_slice %63 {offsets = [0, 1, 0], sizes = [2, 1, 128], strides = [1, 1, 1]} : vector<2x8x128xf32> to vector<2x1x128xf32>
    %87 = vector.shape_cast %86 : vector<2x1x128xf32> to vector<2x128xf32>
    %cst_62 = arith.constant dense<0.000000e+00> : vector<2x128xf32>
    %88 = tpu.matmul %85, %64, %cst_62 {dimension_numbers = #tpu.dot_dimension_numbers<[1], [0], [0], [1], [0, 0, 1, 1], [], []>} : vector<2x32xf32>, vector<32x128xf32>, vector<2x128xf32> -> vector<2x128xf32>
    %89 = arith.addf %87, %88 : vector<2x128xf32>
    %90 = arith.negf %89 : vector<2x128xf32>
    %91 = math.exp %90 : vector<2x128xf32>
    %cst_63 = arith.constant 1.000000e+00 : f32
    %92 = vector.broadcast %cst_63 : f32 to vector<2x128xf32>
    %93 = arith.addf %92, %91 : vector<2x128xf32>
    %94 = arith.divf %92, %93 : vector<2x128xf32>
    %95 = math.tanh %89 : vector<2x128xf32>
    %96 = vector.extract_strided_slice %94 {offsets = [0, 0], sizes = [2, 32], strides = [1, 1]} : vector<2x128xf32> to vector<2x32xf32>
    %97 = vector.extract_strided_slice %94 {offsets = [0, 32], sizes = [2, 32], strides = [1, 1]} : vector<2x128xf32> to vector<2x32xf32>
    %98 = vector.extract_strided_slice %95 {offsets = [0, 64], sizes = [2, 32], strides = [1, 1]} : vector<2x128xf32> to vector<2x32xf32>
    %99 = vector.extract_strided_slice %94 {offsets = [0, 96], sizes = [2, 32], strides = [1, 1]} : vector<2x128xf32> to vector<2x32xf32>
    %100 = arith.mulf %97, %83 : vector<2x32xf32>
    %101 = arith.mulf %96, %98 : vector<2x32xf32>
    %102 = arith.addf %100, %101 : vector<2x32xf32>
    %103 = math.tanh %102 : vector<2x32xf32>
    %104 = arith.mulf %99, %103 : vector<2x32xf32>
    %105 = vector.extract_strided_slice %63 {offsets = [0, 2, 0], sizes = [2, 1, 128], strides = [1, 1, 1]} : vector<2x8x128xf32> to vector<2x1x128xf32>
    %106 = vector.shape_cast %105 : vector<2x1x128xf32> to vector<2x128xf32>
    %cst_64 = arith.constant dense<0.000000e+00> : vector<2x128xf32>
    %107 = tpu.matmul %104, %64, %cst_64 {dimension_numbers = #tpu.dot_dimension_numbers<[1], [0], [0], [1], [0, 0, 1, 1], [], []>} : vector<2x32xf32>, vector<32x128xf32>, vector<2x128xf32> -> vector<2x128xf32>
    %108 = arith.addf %106, %107 : vector<2x128xf32>
    %109 = arith.negf %108 : vector<2x128xf32>
    %110 = math.exp %109 : vector<2x128xf32>
    %cst_65 = arith.constant 1.000000e+00 : f32
    %111 = vector.broadcast %cst_65 : f32 to vector<2x128xf32>
    %112 = arith.addf %111, %110 : vector<2x128xf32>
    %113 = arith.divf %111, %112 : vector<2x128xf32>
    %114 = math.tanh %108 : vector<2x128xf32>
    %115 = vector.extract_strided_slice %113 {offsets = [0, 0], sizes = [2, 32], strides = [1, 1]} : vector<2x128xf32> to vector<2x32xf32>
    %116 = vector.extract_strided_slice %113 {offsets = [0, 32], sizes = [2, 32], strides = [1, 1]} : vector<2x128xf32> to vector<2x32xf32>
    %117 = vector.extract_strided_slice %114 {offsets = [0, 64], sizes = [2, 32], strides = [1, 1]} : vector<2x128xf32> to vector<2x32xf32>
    %118 = vector.extract_strided_slice %113 {offsets = [0, 96], sizes = [2, 32], strides = [1, 1]} : vector<2x128xf32> to vector<2x32xf32>
    %119 = arith.mulf %116, %102 : vector<2x32xf32>
    %120 = arith.mulf %115, %117 : vector<2x32xf32>
    %121 = arith.addf %119, %120 : vector<2x32xf32>
    %122 = math.tanh %121 : vector<2x32xf32>
    %123 = arith.mulf %118, %122 : vector<2x32xf32>
    %124 = vector.extract_strided_slice %63 {offsets = [0, 3, 0], sizes = [2, 1, 128], strides = [1, 1, 1]} : vector<2x8x128xf32> to vector<2x1x128xf32>
    %125 = vector.shape_cast %124 : vector<2x1x128xf32> to vector<2x128xf32>
    %cst_66 = arith.constant dense<0.000000e+00> : vector<2x128xf32>
    %126 = tpu.matmul %123, %64, %cst_66 {dimension_numbers = #tpu.dot_dimension_numbers<[1], [0], [0], [1], [0, 0, 1, 1], [], []>} : vector<2x32xf32>, vector<32x128xf32>, vector<2x128xf32> -> vector<2x128xf32>
    %127 = arith.addf %125, %126 : vector<2x128xf32>
    %128 = arith.negf %127 : vector<2x128xf32>
    %129 = math.exp %128 : vector<2x128xf32>
    %cst_67 = arith.constant 1.000000e+00 : f32
    %130 = vector.broadcast %cst_67 : f32 to vector<2x128xf32>
    %131 = arith.addf %130, %129 : vector<2x128xf32>
    %132 = arith.divf %130, %131 : vector<2x128xf32>
    %133 = math.tanh %127 : vector<2x128xf32>
    %134 = vector.extract_strided_slice %132 {offsets = [0, 0], sizes = [2, 32], strides = [1, 1]} : vector<2x128xf32> to vector<2x32xf32>
    %135 = vector.extract_strided_slice %132 {offsets = [0, 32], sizes = [2, 32], strides = [1, 1]} : vector<2x128xf32> to vector<2x32xf32>
    %136 = vector.extract_strided_slice %133 {offsets = [0, 64], sizes = [2, 32], strides = [1, 1]} : vector<2x128xf32> to vector<2x32xf32>
    %137 = vector.extract_strided_slice %132 {offsets = [0, 96], sizes = [2, 32], strides = [1, 1]} : vector<2x128xf32> to vector<2x32xf32>
    %138 = arith.mulf %135, %121 : vector<2x32xf32>
    %139 = arith.mulf %134, %136 : vector<2x32xf32>
    %140 = arith.addf %138, %139 : vector<2x32xf32>
    %141 = math.tanh %140 : vector<2x32xf32>
    %142 = arith.mulf %137, %141 : vector<2x32xf32>
    %143 = vector.extract_strided_slice %63 {offsets = [0, 4, 0], sizes = [2, 1, 128], strides = [1, 1, 1]} : vector<2x8x128xf32> to vector<2x1x128xf32>
    %144 = vector.shape_cast %143 : vector<2x1x128xf32> to vector<2x128xf32>
    %cst_68 = arith.constant dense<0.000000e+00> : vector<2x128xf32>
    %145 = tpu.matmul %142, %64, %cst_68 {dimension_numbers = #tpu.dot_dimension_numbers<[1], [0], [0], [1], [0, 0, 1, 1], [], []>} : vector<2x32xf32>, vector<32x128xf32>, vector<2x128xf32> -> vector<2x128xf32>
    %146 = arith.addf %144, %145 : vector<2x128xf32>
    %147 = arith.negf %146 : vector<2x128xf32>
    %148 = math.exp %147 : vector<2x128xf32>
    %cst_69 = arith.constant 1.000000e+00 : f32
    %149 = vector.broadcast %cst_69 : f32 to vector<2x128xf32>
    %150 = arith.addf %149, %148 : vector<2x128xf32>
    %151 = arith.divf %149, %150 : vector<2x128xf32>
    %152 = math.tanh %146 : vector<2x128xf32>
    %153 = vector.extract_strided_slice %151 {offsets = [0, 0], sizes = [2, 32], strides = [1, 1]} : vector<2x128xf32> to vector<2x32xf32>
    %154 = vector.extract_strided_slice %151 {offsets = [0, 32], sizes = [2, 32], strides = [1, 1]} : vector<2x128xf32> to vector<2x32xf32>
    %155 = vector.extract_strided_slice %152 {offsets = [0, 64], sizes = [2, 32], strides = [1, 1]} : vector<2x128xf32> to vector<2x32xf32>
    %156 = vector.extract_strided_slice %151 {offsets = [0, 96], sizes = [2, 32], strides = [1, 1]} : vector<2x128xf32> to vector<2x32xf32>
    %157 = arith.mulf %154, %140 : vector<2x32xf32>
    %158 = arith.mulf %153, %155 : vector<2x32xf32>
    %159 = arith.addf %157, %158 : vector<2x32xf32>
    %160 = math.tanh %159 : vector<2x32xf32>
    %161 = arith.mulf %156, %160 : vector<2x32xf32>
    %162 = vector.extract_strided_slice %63 {offsets = [0, 5, 0], sizes = [2, 1, 128], strides = [1, 1, 1]} : vector<2x8x128xf32> to vector<2x1x128xf32>
    %163 = vector.shape_cast %162 : vector<2x1x128xf32> to vector<2x128xf32>
    %cst_70 = arith.constant dense<0.000000e+00> : vector<2x128xf32>
    %164 = tpu.matmul %161, %64, %cst_70 {dimension_numbers = #tpu.dot_dimension_numbers<[1], [0], [0], [1], [0, 0, 1, 1], [], []>} : vector<2x32xf32>, vector<32x128xf32>, vector<2x128xf32> -> vector<2x128xf32>
    %165 = arith.addf %163, %164 : vector<2x128xf32>
    %166 = arith.negf %165 : vector<2x128xf32>
    %167 = math.exp %166 : vector<2x128xf32>
    %cst_71 = arith.constant 1.000000e+00 : f32
    %168 = vector.broadcast %cst_71 : f32 to vector<2x128xf32>
    %169 = arith.addf %168, %167 : vector<2x128xf32>
    %170 = arith.divf %168, %169 : vector<2x128xf32>
    %171 = math.tanh %165 : vector<2x128xf32>
    %172 = vector.extract_strided_slice %170 {offsets = [0, 0], sizes = [2, 32], strides = [1, 1]} : vector<2x128xf32> to vector<2x32xf32>
    %173 = vector.extract_strided_slice %170 {offsets = [0, 32], sizes = [2, 32], strides = [1, 1]} : vector<2x128xf32> to vector<2x32xf32>
    %174 = vector.extract_strided_slice %171 {offsets = [0, 64], sizes = [2, 32], strides = [1, 1]} : vector<2x128xf32> to vector<2x32xf32>
    %175 = vector.extract_strided_slice %170 {offsets = [0, 96], sizes = [2, 32], strides = [1, 1]} : vector<2x128xf32> to vector<2x32xf32>
    %176 = arith.mulf %173, %159 : vector<2x32xf32>
    %177 = arith.mulf %172, %174 : vector<2x32xf32>
    %178 = arith.addf %176, %177 : vector<2x32xf32>
    %179 = math.tanh %178 : vector<2x32xf32>
    %180 = arith.mulf %175, %179 : vector<2x32xf32>
    %181 = vector.extract_strided_slice %63 {offsets = [0, 6, 0], sizes = [2, 1, 128], strides = [1, 1, 1]} : vector<2x8x128xf32> to vector<2x1x128xf32>
    %182 = vector.shape_cast %181 : vector<2x1x128xf32> to vector<2x128xf32>
    %cst_72 = arith.constant dense<0.000000e+00> : vector<2x128xf32>
    %183 = tpu.matmul %180, %64, %cst_72 {dimension_numbers = #tpu.dot_dimension_numbers<[1], [0], [0], [1], [0, 0, 1, 1], [], []>} : vector<2x32xf32>, vector<32x128xf32>, vector<2x128xf32> -> vector<2x128xf32>
    %184 = arith.addf %182, %183 : vector<2x128xf32>
    %185 = arith.negf %184 : vector<2x128xf32>
    %186 = math.exp %185 : vector<2x128xf32>
    %cst_73 = arith.constant 1.000000e+00 : f32
    %187 = vector.broadcast %cst_73 : f32 to vector<2x128xf32>
    %188 = arith.addf %187, %186 : vector<2x128xf32>
    %189 = arith.divf %187, %188 : vector<2x128xf32>
    %190 = math.tanh %184 : vector<2x128xf32>
    %191 = vector.extract_strided_slice %189 {offsets = [0, 0], sizes = [2, 32], strides = [1, 1]} : vector<2x128xf32> to vector<2x32xf32>
    %192 = vector.extract_strided_slice %189 {offsets = [0, 32], sizes = [2, 32], strides = [1, 1]} : vector<2x128xf32> to vector<2x32xf32>
    %193 = vector.extract_strided_slice %190 {offsets = [0, 64], sizes = [2, 32], strides = [1, 1]} : vector<2x128xf32> to vector<2x32xf32>
    %194 = vector.extract_strided_slice %189 {offsets = [0, 96], sizes = [2, 32], strides = [1, 1]} : vector<2x128xf32> to vector<2x32xf32>
    %195 = arith.mulf %192, %178 : vector<2x32xf32>
    %196 = arith.mulf %191, %193 : vector<2x32xf32>
    %197 = arith.addf %195, %196 : vector<2x32xf32>
    %198 = math.tanh %197 : vector<2x32xf32>
    %199 = arith.mulf %194, %198 : vector<2x32xf32>
    %200 = vector.extract_strided_slice %63 {offsets = [0, 7, 0], sizes = [2, 1, 128], strides = [1, 1, 1]} : vector<2x8x128xf32> to vector<2x1x128xf32>
    %201 = vector.shape_cast %200 : vector<2x1x128xf32> to vector<2x128xf32>
    %cst_74 = arith.constant dense<0.000000e+00> : vector<2x128xf32>
    %202 = tpu.matmul %199, %64, %cst_74 {dimension_numbers = #tpu.dot_dimension_numbers<[1], [0], [0], [1], [0, 0, 1, 1], [], []>} : vector<2x32xf32>, vector<32x128xf32>, vector<2x128xf32> -> vector<2x128xf32>
    %203 = arith.addf %201, %202 : vector<2x128xf32>
    %204 = arith.negf %203 : vector<2x128xf32>
    %205 = math.exp %204 : vector<2x128xf32>
    %cst_75 = arith.constant 1.000000e+00 : f32
    %206 = vector.broadcast %cst_75 : f32 to vector<2x128xf32>
    %207 = arith.addf %206, %205 : vector<2x128xf32>
    %208 = arith.divf %206, %207 : vector<2x128xf32>
    %209 = math.tanh %203 : vector<2x128xf32>
    %210 = vector.extract_strided_slice %208 {offsets = [0, 0], sizes = [2, 32], strides = [1, 1]} : vector<2x128xf32> to vector<2x32xf32>
    %211 = vector.extract_strided_slice %208 {offsets = [0, 32], sizes = [2, 32], strides = [1, 1]} : vector<2x128xf32> to vector<2x32xf32>
    %212 = vector.extract_strided_slice %209 {offsets = [0, 64], sizes = [2, 32], strides = [1, 1]} : vector<2x128xf32> to vector<2x32xf32>
    %213 = vector.extract_strided_slice %208 {offsets = [0, 96], sizes = [2, 32], strides = [1, 1]} : vector<2x128xf32> to vector<2x32xf32>
    %214 = arith.mulf %211, %197 : vector<2x32xf32>
    %215 = arith.mulf %210, %212 : vector<2x32xf32>
    %216 = arith.addf %214, %215 : vector<2x32xf32>
    %217 = math.tanh %216 : vector<2x32xf32>
    %218 = arith.mulf %213, %217 : vector<2x32xf32>
    %219 = vector.shape_cast %57 : vector<16x16xf32> to vector<2x8x16xf32>
    %220 = vector.extract_strided_slice %219 {offsets = [0, 7, 0], sizes = [2, 1, 16], strides = [1, 1, 1]} : vector<2x8x16xf32> to vector<2x1x16xf32>
    %221 = vector.shape_cast %220 : vector<2x1x16xf32> to vector<2x16xf32>
    %c0_76 = arith.constant 0 : index
    %c0_77 = arith.constant 0 : index
    %222 = vector.load %arg8[%c0_76, %c0_77] : memref<16x128xf32, #tpu.memory_space<vmem>>, vector<16x128xf32>
    %cst_78 = arith.constant dense<0.000000e+00> : vector<2x128xf32>
    %223 = tpu.matmul %221, %222, %cst_78 {dimension_numbers = #tpu.dot_dimension_numbers<[1], [0], [0], [1], [0, 0, 1, 1], [], []>} : vector<2x16xf32>, vector<16x128xf32>, vector<2x128xf32> -> vector<2x128xf32>
    %c0_79 = arith.constant 0 : index
    %c0_80 = arith.constant 0 : index
    %224 = vector.load %arg9[%c0_79, %c0_80] : memref<1x128xf32, #tpu.memory_space<vmem>>, vector<1x128xf32>
    %225 = vector.broadcast %224 : vector<1x128xf32> to vector<2x128xf32>
    %226 = arith.addf %223, %225 : vector<2x128xf32>
    %227 = arith.negf %226 : vector<2x128xf32>
    %228 = math.exp %227 : vector<2x128xf32>
    %cst_81 = arith.constant 1.000000e+00 : f32
    %229 = vector.broadcast %cst_81 : f32 to vector<2x128xf32>
    %230 = arith.addf %229, %228 : vector<2x128xf32>
    %231 = arith.divf %229, %230 : vector<2x128xf32>
    %232 = math.tanh %226 : vector<2x128xf32>
    %233 = vector.extract_strided_slice %231 {offsets = [0, 0], sizes = [2, 32], strides = [1, 1]} : vector<2x128xf32> to vector<2x32xf32>
    %234 = vector.extract_strided_slice %232 {offsets = [0, 64], sizes = [2, 32], strides = [1, 1]} : vector<2x128xf32> to vector<2x32xf32>
    %235 = arith.mulf %233, %234 : vector<2x32xf32>
    %236 = vector.extract_strided_slice %231 {offsets = [0, 96], sizes = [2, 32], strides = [1, 1]} : vector<2x128xf32> to vector<2x32xf32>
    %237 = math.tanh %235 : vector<2x32xf32>
    %238 = arith.mulf %236, %237 : vector<2x32xf32>
    %c0_82 = arith.constant 0 : index
    %c0_83 = arith.constant 0 : index
    %239 = vector.load %arg17[%c0_82, %c0_83] : memref<2x64xf32, #tpu.memory_space<vmem>>, vector<2x32xf32>
    tpu.vector_store %arg17[%c0_82, %c0_83], %218 {strides = array<i32>} : memref<2x64xf32, #tpu.memory_space<vmem>>, vector<2x32xf32>,
    %c0_84 = arith.constant 0 : index
    %c32 = arith.constant 32 : index
    %240 = vector.load %arg17[%c0_84, %c32] : memref<2x64xf32, #tpu.memory_space<vmem>>, vector<2x32xf32>
    tpu.vector_store %arg17[%c0_84, %c32], %238 {strides = array<i32>} : memref<2x64xf32, #tpu.memory_space<vmem>>, vector<2x32xf32>,
    %c0_85 = arith.constant 0 : index
    %c0_86 = arith.constant 0 : index
    %241 = vector.load %arg10[%c0_85, %c0_86] : memref<64x32xf32, #tpu.memory_space<vmem>>, vector<64x32xf32>
    %242 = vector.extract_strided_slice %241 {offsets = [0, 0], sizes = [32, 32], strides = [1, 1]} : vector<64x32xf32> to vector<32x32xf32>
    %cst_87 = arith.constant dense<0.000000e+00> : vector<2x32xf32>
    %243 = tpu.matmul %218, %242, %cst_87 {dimension_numbers = #tpu.dot_dimension_numbers<[1], [0], [0], [1], [0, 0, 1, 1], [], []>} : vector<2x32xf32>, vector<32x32xf32>, vector<2x32xf32> -> vector<2x32xf32>
    %244 = vector.extract_strided_slice %241 {offsets = [32, 0], sizes = [32, 32], strides = [1, 1]} : vector<64x32xf32> to vector<32x32xf32>
    %cst_88 = arith.constant dense<0.000000e+00> : vector<2x32xf32>
    %245 = tpu.matmul %238, %244, %cst_88 {dimension_numbers = #tpu.dot_dimension_numbers<[1], [0], [0], [1], [0, 0, 1, 1], [], []>} : vector<2x32xf32>, vector<32x32xf32>, vector<2x32xf32> -> vector<2x32xf32>
    %246 = arith.addf %243, %245 : vector<2x32xf32>
    %c0_89 = arith.constant 0 : index
    %c0_90 = arith.constant 0 : index
    %247 = vector.load %arg11[%c0_89, %c0_90] : memref<1x32xf32, #tpu.memory_space<vmem>>, vector<1x32xf32>
    %248 = vector.broadcast %247 : vector<1x32xf32> to vector<2x32xf32>
    %249 = arith.addf %246, %248 : vector<2x32xf32>
    %cst_91 = arith.constant 0.000000e+00 : f32
    %250 = vector.broadcast %cst_91 : f32 to vector<2x32xf32>
    %251 = arith.maximumf %249, %250 : vector<2x32xf32>
    %c0_92 = arith.constant 0 : index
    %c0_93 = arith.constant 0 : index
    %252 = vector.load %arg12[%c0_92, %c0_93] : memref<32x32xf32, #tpu.memory_space<vmem>>, vector<32x32xf32>
    %cst_94 = arith.constant dense<0.000000e+00> : vector<2x32xf32>
    %253 = tpu.matmul %251, %252, %cst_94 {dimension_numbers = #tpu.dot_dimension_numbers<[1], [0], [0], [1], [0, 0, 1, 1], [], []>} : vector<2x32xf32>, vector<32x32xf32>, vector<2x32xf32> -> vector<2x32xf32>
    %c0_95 = arith.constant 0 : index
    %c0_96 = arith.constant 0 : index
    %254 = vector.load %arg13[%c0_95, %c0_96] : memref<1x32xf32, #tpu.memory_space<vmem>>, vector<1x32xf32>
    %255 = vector.broadcast %254 : vector<1x32xf32> to vector<2x32xf32>
    %256 = arith.addf %253, %255 : vector<2x32xf32>
    %cst_97 = arith.constant 0.000000e+00 : f32
    %257 = vector.broadcast %cst_97 : f32 to vector<2x32xf32>
    %258 = arith.maximumf %256, %257 : vector<2x32xf32>
    %c0_98 = arith.constant 0 : index
    %c0_99 = arith.constant 0 : index
    %259 = vector.load %arg14[%c0_98, %c0_99] : memref<32x4xf32, #tpu.memory_space<vmem>>, vector<32x4xf32>
    %cst_100 = arith.constant dense<0.000000e+00> : vector<2x4xf32>
    %260 = tpu.matmul %258, %259, %cst_100 {dimension_numbers = #tpu.dot_dimension_numbers<[1], [0], [0], [1], [0, 0, 1, 1], [], []>} : vector<2x32xf32>, vector<32x4xf32>, vector<2x4xf32> -> vector<2x4xf32>
    %c0_101 = arith.constant 0 : index
    %c0_102 = arith.constant 0 : index
    %261 = vector.load %arg15[%c0_101, %c0_102] : memref<1x4xf32, #tpu.memory_space<vmem>>, vector<1x4xf32>
    %262 = vector.broadcast %261 : vector<1x4xf32> to vector<2x4xf32>
    %263 = arith.addf %260, %262 : vector<2x4xf32>
    %c0_103 = arith.constant 0 : index
    %c0_104 = arith.constant 0 : index
    %264 = vector.load %arg16[%c0_103, %c0_104] : memref<2x4xf32, #tpu.memory_space<vmem>>, vector<2x4xf32>
    tpu.vector_store %arg16[%c0_103, %c0_104], %263 {strides = array<i32>} : memref<2x4xf32, #tpu.memory_space<vmem>>, vector<2x4xf32>,
    return
  }
}

</mosaic_0001>

<bundles_post_ra>
// kernel: complex_lstm_forward.1
= control target key start
LH: loop header
LB: loop body
LE: loop exit
PB: predicated region body
PF: predicated region fallthrough
CT: control target
= control target key end

     0   :  { %s3710_s0 = inlined_call_operand.vmem [shape: f32[2,8,4], index: 0, kind: input, shape index: {}]   ;;  %s3711_s1 = inlined_call_operand.hbm [shape: f32[3,4,16], index: 1, kind: input, shape index: {}]   ;;  %s3712_s2 = inlined_call_operand.vmem [shape: f32[1,16], index: 2, kind: input, shape index: {}]   ;;  %s3713_s3 = inlined_call_operand.vmem [shape: f32[3,16,16], index: 3, kind: input, shape index: {}]   ;;  %s3714_s4 = inlined_call_operand.vmem [shape: f32[1,16], index: 4, kind: input, shape index: {}]   ;;  %s3715_s5 = inlined_call_operand.vmem [shape: f32[16,128], index: 5, kind: input, shape index: {}]   ;;  %s3716_s6 = inlined_call_operand.vmem [shape: f32[32,128], index: 6, kind: input, shape index: {}]   ;;  %s3717_s7 = inlined_call_operand.hbm [shape: f32[1,128], index: 7, kind: input, shape index: {}]   ;;  %s3718_s8 = inlined_call_operand.vmem [shape: f32[16,128], index: 8, kind: input, shape index: {}]   ;;  %s3719_s9 = inlined_call_operand.hbm [shape: f32[1,128], index: 9, kind: input, shape index: {}]   ;;  %s3720_s10 = inlined_call_operand.vmem [shape: f32[64,32], index: 10, kind: input, shape index: {}]   ;;  %s3721_s11 = inlined_call_operand.hbm [shape: f32[1,32], index: 11, kind: input, shape index: {}]   ;;  %s3722_s12 = inlined_call_operand.vmem [shape: f32[32,32], index: 12, kind: input, shape index: {}]   ;;  %s3723_s13 = inlined_call_operand.hbm [shape: f32[1,32], index: 13, kind: input, shape index: {}]   ;;  %s3724_s14 = inlined_call_operand.vmem [shape: f32[32,4], index: 14, kind: input, shape index: {}]   ;;  %s3725_s15 = inlined_call_operand.hbm [shape: f32[1,4], index: 15, kind: input, shape index: {}]   ;;  %s3726_s16 = inlined_call_operand.hbm [shape: f32[2,4], index: 16, kind: output, shape index: {0}]   ;;  %s3727_s17 = inlined_call_operand.hbm [shape: f32[2,64], index: 17, kind: output, shape index: {1}]  }
   0x1   :  { %3730 = sst [smem:[#allocation24_spill]] %s3710_s0 }
   0x2   :  { %3731 = sst [smem:[#allocation25_spill]] %s3711_s1 }
   0x3   :  { %23 = vsyncpa [#allocation5], 0 }
   0x4   :  { %24 = vsyncpa [#allocation8], 0 }
   0x5   :  { %25 = vsyncpa [#allocation11], 0 }
   0x6   :  { %26 = vsyncpa [#allocation14], 0 }
   0x7   :  { %27 = vsyncpa [#allocation6], 0 }
   0x8   :  { %28 = vsyncpa [#allocation17], 0  ;;  %s3178_s24 = smov [#allocation7]   ;;  %s3179_s26 = smov [#allocation10]  }
   0x9   :  { %s59_s25 = sshll.u32 %s3178_s24, 4  ;;  %s83_s27 = sshll.u32 %s3179_s26, 4  ;;  %s60_s25 = int_to_ptr.vmem [resolvable:$true] %s59_s25  ;;  %s84_s27 = int_to_ptr.vmem [resolvable:$true] %s83_s27 }
   0xa   :  { %s2990_s0 = scalar_lea.hbm %s3717_s7, 16 }
   0xb   :  { %p2991_p0 = scmp.ne.s32.totalorder %s3717_s7, %s2990_s0  ;;  %p2994_p1 = scmp.lt.u32.totalorder %s2990_s0, %s3717_s7 }
   0xd   :  { %p2996_p2 = pnand %p2994_p1, %p2991_p0 }
   0xf   :  { %2999 = shalt.err (!%p2996_p2)
}
  0x10   :  { %s3000_s20 = scalar_lea.vmem %s60_s25, 16  ;;  %s3004_s21 = scalar_lea.vmem %s60_s25, 32 }
  0x11   :  { %p3001_p3 = scmp.ne.s32.totalorder %s60_s25, %s3000_s20  ;;  %p3005_p4 = scmp.lt.s32.totalorder %s60_s25, %s60_s25 }
  0x12   :  { %p3006_p5 = scmp.lt.s32.totalorder %s3004_s21, %s3000_s20 }
  0x14   :  { %p3007_p6 = por %p3006_p5, %p3005_p4 }
  0x16   :  { %p3008_p7 = pnand %p3007_p6, %p3001_p3 }
  0x18   :  { %3011 = shalt.err (!%p3008_p7)
}
  0x19   :  { %62 = dma.hbm_to_vmem [thread:$0]  %s3717_s7, 16, %s60_s25, [#allocation8]  }
  0x1a   :  { %s3012_s28 = scalar_lea.hbm %s3721_s11, 16 }
  0x1b   :  { %p3013_p8 = scmp.ne.s32.totalorder %s3721_s11, %s3012_s28  ;;  %p3016_p9 = scmp.lt.u32.totalorder %s3012_s28, %s3721_s11 }
  0x1d   :  { %p3018_p10 = pnand %p3016_p9, %p3013_p8 }
  0x1f   :  { %3021 = shalt.err (!%p3018_p10)
}
  0x20   :  { %s3022_s19 = scalar_lea.vmem %s84_s27, 16  ;;  %s3026_s1 = scalar_lea.vmem %s84_s27, 32 }
  0x21   :  { %p3023_p11 = scmp.ne.s32.totalorder %s84_s27, %s3022_s19  ;;  %p3027_p12 = scmp.lt.s32.totalorder %s84_s27, %s84_s27 }
  0x22   :  { %p3028_p13 = scmp.lt.s32.totalorder %s3026_s1, %s3022_s19 }
  0x24   :  { %p3029_p0 = por %p3028_p13, %p3027_p12 }
  0x26   :  { %p3030_p1 = pnand %p3029_p0, %p3023_p11 }
  0x28   :  { %3033 = shalt.err (!%p3030_p1)
}
  0x29   :  { %86 = dma.hbm_to_vmem [thread:$0]  %s3721_s11, 16, %s84_s27, [#allocation11]  }
  0x2a   :  { %s3180_s20 = smov [#allocation4]   ;;  %s3732_s24 = sld [smem:[#allocation25_spill]] }
  0x2b   :  { %s36_s21 = sshll.u32 %s3180_s20, 4  ;;  %s37_s21 = int_to_ptr.vmem [resolvable:$true] %s36_s21 }
  0x30   :  { %s3034_s26 = scalar_lea.hbm %s3732_s24, 192 }
  0x31   :  { %p3035_p2 = scmp.ne.s32.totalorder %s3732_s24, %s3034_s26  ;;  %p3038_p3 = scmp.lt.u32.totalorder %s3034_s26, %s3732_s24 }
  0x33   :  { %p3040_p4 = pnand %p3038_p3, %p3035_p2 }
  0x35   :  { %3043 = shalt.err (!%p3040_p4)
}
  0x36   :  { %s3044_s18 = scalar_lea.vmem %s37_s21, 192  ;;  %p3049_p6 = scmp.lt.s32.totalorder %s37_s21, %s37_s21 }
  0x37   :  { %p3045_p5 = scmp.ne.s32.totalorder %s37_s21, %s3044_s18  ;;  %p3050_p7 = scmp.lt.s32.totalorder %s3044_s18, %s3044_s18 }
  0x39   :  { %p3051_p8 = por %p3050_p7, %p3049_p6 }
  0x3b   :  { %p3052_p9 = pnand %p3051_p8, %p3045_p5 }
  0x3d   :  { %3055 = shalt.err (!%p3052_p9)
}
  0x3e   :  { %s3181_s11 = smov 64   ;;  %s3182_s27 = smov 4  }
  0x3f   :  { %42 = dma.hbm_to_vmem [thread:$0]  %s3732_s24, 192, %s37_s21, [#allocation5], %s3181_s11, %s3181_s11, %s3182_s27  }
  0x40   :  { %s3183_s7 = smov [#allocation9]   ;;  %s3184_s20 = smov [#allocation12]  }
  0x41   :  { %s71_s25 = sshll.u32 %s3183_s7, 4  ;;  %s95_s22 = sshll.u32 %s3184_s20, 4  ;;  %s72_s25 = int_to_ptr.vmem [resolvable:$true] %s71_s25  ;;  %s96_s22 = int_to_ptr.vmem [resolvable:$true] %s95_s22 }
  0x42   :  { %s3056_s28 = scalar_lea.hbm %s3719_s9, 16 }
  0x43   :  { %p3057_p10 = scmp.ne.s32.totalorder %s3719_s9, %s3056_s28  ;;  %p3060_p11 = scmp.lt.u32.totalorder %s3056_s28, %s3719_s9 }
  0x45   :  { %p3062_p12 = pnand %p3060_p11, %p3057_p10 }
  0x47   :  { %3065 = shalt.err (!%p3062_p12)
}
  0x48   :  { %s3066_s21 = scalar_lea.vmem %s72_s25, 16  ;;  %s3070_s24 = scalar_lea.vmem %s72_s25, 32 }
  0x49   :  { %p3067_p13 = scmp.ne.s32.totalorder %s72_s25, %s3066_s21  ;;  %p3071_p0 = scmp.lt.s32.totalorder %s72_s25, %s72_s25 }
  0x4a   :  { %p3072_p1 = scmp.lt.s32.totalorder %s3070_s24, %s3066_s21 }
  0x4c   :  { %p3073_p2 = por %p3072_p1, %p3071_p0 }
  0x4e   :  { %p3074_p3 = pnand %p3073_p2, %p3067_p13 }
  0x50   :  { %3077 = shalt.err (!%p3074_p3)
}
  0x51   :  { %74 = dma.hbm_to_vmem [thread:$0]  %s3719_s9, 16, %s72_s25, [#allocation8]  }
  0x52   :  { %s3078_s20 = scalar_lea.hbm %s3723_s13, 16 }
  0x53   :  { %p3079_p4 = scmp.ne.s32.totalorder %s3723_s13, %s3078_s20  ;;  %p3082_p5 = scmp.lt.u32.totalorder %s3078_s20, %s3723_s13 }
  0x55   :  { %p3084_p6 = pnand %p3082_p5, %p3079_p4 }
  0x57   :  { %3087 = shalt.err (!%p3084_p6)
}
  0x58   :  { %s3088_s0 = scalar_lea.vmem %s96_s22, 16  ;;  %s3092_s30 = scalar_lea.vmem %s96_s22, 32 }
  0x59   :  { %p3089_p7 = scmp.ne.s32.totalorder %s96_s22, %s3088_s0  ;;  %p3093_p8 = scmp.lt.s32.totalorder %s96_s22, %s96_s22 }
  0x5a   :  { %p3094_p9 = scmp.lt.s32.totalorder %s3092_s30, %s3088_s0 }
  0x5c   :  { %p3095_p10 = por %p3094_p9, %p3093_p8 }
  0x5e   :  { %p3096_p11 = pnand %p3095_p10, %p3089_p7 }
  0x60   :  { %3099 = shalt.err (!%p3096_p11)
}
  0x61   :  { %98 = dma.hbm_to_vmem [thread:$0]  %s3723_s13, 16, %s96_s22, [#allocation11]  }
  0x62   :  { %s3185_s18 = smov [#allocation13]   ;;  %s3100_s19 = scalar_lea.hbm %s3725_s15, 16 }
  0x63   :  { %s107_s21 = sshll.u32 %s3185_s18, 4  ;;  %p3101_p12 = scmp.ne.s32.totalorder %s3725_s15, %s3100_s19  ;;  %s108_s21 = int_to_ptr.vmem [resolvable:$true] %s107_s21 }
  0x64   :  { %p3104_p13 = scmp.lt.u32.totalorder %s3100_s19, %s3725_s15 }
  0x66   :  { %p3106_p0 = pnand %p3104_p13, %p3101_p12 }
  0x68   :  { %3109 = shalt.err (!%p3106_p0)
}
  0x69   :  { %s3110_s26 = scalar_lea.vmem %s108_s21, 16  ;;  %s3114_s13 = scalar_lea.vmem %s108_s21, 32 }
  0x6a   :  { %p3111_p1 = scmp.ne.s32.totalorder %s108_s21, %s3110_s26  ;;  %p3115_p2 = scmp.lt.s32.totalorder %s108_s21, %s108_s21 }
  0x6b   :  { %p3116_p3 = scmp.lt.s32.totalorder %s3114_s13, %s3110_s26 }
  0x6d   :  { %p3117_p4 = por %p3116_p3, %p3115_p2 }
  0x6f   :  { %p3118_p5 = pnand %p3117_p4, %p3111_p1 }
  0x71   :  { %3121 = shalt.err (!%p3118_p5)
}
  0x72   :  { %110 = dma.hbm_to_vmem [thread:$0]  %s3725_s15, 16, %s108_s21, [#allocation14]  }
  0x73   :  { %3166 = dma.done.wait [#allocation5], 192  }
  0x74   :  { %3167 = vsyncadd [#allocation5], 4294967104 }
  0x75   :  { %3168 = dma.done.wait [#allocation8], 32  }
  0x76   :  { %3169 = vsyncadd [#allocation8], 4294967264 }
  0x77   :  { %3170 = dma.done.wait [#allocation11], 32  }
  0x78   :  { %3171 = vsyncadd [#allocation11], 4294967264 }
  0x79   :  { %3172 = dma.done.wait [#allocation14], 16  }
  0x7a   :  { %3173 = vsyncadd [#allocation14], 4294967280  ;;  %vm129_vm0 = vcmask 31744   ;;  %vm131_vm1 = vcmask 25600   ;;  %v3186_v0 = vmov 0.0   ;;  %vm158_vm2 = vcmask 1043456  }
  0x7b   :  { %130 = vst.msk [vmem:[#allocation2] sm:$0xff] %vm129_vm0, %v3186_v0  ;;  %133 = vst.msk [vmem:[#allocation2 + $0x10] sm:$0xff] %vm129_vm0, %v3186_v0  ;;  %v151_v1 = vld [vmem:[#allocation4] sm:$0xf]  ;;  %s3733_s0 = sld [smem:[#allocation24_spill]]  ;;  %vm241_vm3 = vcmask 1046528  }
  0x7c   :  { %132 = vst.msk [vmem:[#allocation2 + $0x8] sm:$0x3] %vm131_vm1, %v3186_v0  ;;  %134 = vst.msk [vmem:[#allocation2 + $0x18] sm:$0x3] %vm131_vm1, %v3186_v0  ;;  %v249_v3 = vld [vmem:[#allocation4 + $0x4] sm:$0xf]  ;;  %2554 = vmatprep.subr.msk.mxu0 %vm158_vm2, %v151_v1 }
  0x7d   :  { %2555 = vmatpush3.msk.msra.mxu0 %vm158_vm2, %v151_v1  ;;  %v342_v7 = vld [vmem:[#allocation4 + $0x8] sm:$0xf]  ;;  %vm334_vm4 = vcmask 1045504   ;;  %vm429_vm5 = vcmask 130048   ;;  %vm431_vm6 = vcmask 123904   ;;  %v449_v22 = vld [vmem:[%s3713_s3] sm:$0xff] }
  0x7e   :  { %2559 = vmatprep.subr.msk.mxu0 %vm158_vm2, %v249_v3  ;;  %433 = vst.msk [vmem:[#allocation3 + $0x10] sm:$0xff] %vm429_vm5, %v3186_v0  ;;  %430 = vst.msk [vmem:[#allocation3] sm:$0xff] %vm429_vm5, %v3186_v0  ;;  %v450_v23 = vld [vmem:[%s3713_s3 + $0x8] sm:$0xff]  ;;  %v2422_v25 = vld [vmem:[%s3713_s3 + $0x10] sm:$0xff]  ;;  %v3187_v51 = vmov 0.0|0.0   ;;  %vm3188_vm7 = vmmov 0  }
  0x7f   :  { %434 = vst.msk [vmem:[#allocation3 + $0x18] sm:$0x3] %vm431_vm6, %v3186_v0  ;;  %432 = vst.msk [vmem:[#allocation3 + $0x8] sm:$0x3] %vm431_vm6, %v3186_v0  ;;  %v2736_v24 = vpack.c.bf16 %v450_v23, %v449_v22  ;;  %v2423_v26 = vld [vmem:[%s3713_s3 + $0x18] sm:$0xff]  ;;  %v2426_v35 = vld [vmem:[%s3713_s3 + $0x20] sm:$0xff] }
  0x80   :  { %v2740_v27 = vpack.c.bf16 %v2423_v26, %v2422_v25  ;;  %v2409_v28 = vld [vmem:[%s3712_s2] ss:$0 sm:$0xff]  ;;  %v2427_v36 = vld [vmem:[%s3713_s3 + $0x28] sm:$0xff]  ;;  %v810_v60 = vld [vmem:[%s3716_s6 + $0x10] sm:$0xff]  ;;  %vm943_vm8 = vcmask 1041409   ;;  %vm812_vm9 = vcmask 261120  }
  0x81   :  { %v135_v2 = vld [vmem:[%s3733_s0] sm:$0xff]  ;;  %v136_v4 = vld [vmem:[%s3733_s0 + $0x8] sm:$0xff]  ;;  %2737 = vmatprep.subr.bf16.mxu1 %v2736_v24  ;;  %v2744_v39 = vpack.c.bf16 %v2427_v36, %v2426_v35  ;;  %v811_v62 = vld [vmem:[%s3716_s6 + $0x18] sm:$0xff]  ;;  %s3190_s24 = smov 96   ;;  %vm2031_vm10 = vcmask 253952   ;;  %vm2029_vm11 = vcmask 261127  }
  0x82   :  { %137 = vst.msk [vmem:[#allocation2 + $0x1] sm:$0xff] %vm129_vm0, %v135_v2  ;;  %138 = vst.msk [vmem:[#allocation2 + $0x11] sm:$0xff] %vm129_vm0, %v136_v4  ;;  %2739 = vmatpush3.bf16.msra.mxu1 %v2736_v24  ;;  %v808_v52 = vld [vmem:[%s3716_s6] sm:$0xff]  ;;  %v809_v53 = vld [vmem:[%s3716_s6 + $0x8] sm:$0xff]  ;;  %v3451_v63 = vpack.c.bf16 %v811_v62, %v810_v60  ;;  %vm2037_vm12 = vcmask 517376   ;;  %s3191_s28 = smov [#allocation16]  }
  0x83   :  { %2741 = vmatprep.subr.bf16.mxu1 %v2740_v27  ;;  %v3433_v56 = vpack.c.bf16 %v809_v53, %v808_v52  ;;  %v718_v58 = vld [vmem:[%s3715_s5] sm:$0xff]  ;;  %v719_v59 = vld [vmem:[%s3715_s5 + $0x8] sm:$0xff]  ;;  %s2393_s2 = sshll.u32 %s3191_s28, 4  ;;  %s2394_s2 = int_to_ptr.vmem [resolvable:$true] %s2393_s2 }
  0x84   :  { %v2748_v61 = vpack.c.bf16 %v719_v59, %v718_v58  ;;  %v2419_v1 = vld [vmem:[%s3714_s4] ss:$0 sm:$0xff]  ;;  %s3189_s4 = smov 32   ;;  %s3122_s3 = scalar_lea.vmem %s2394_s2, 32 }
  0x85   :  { %p3123_p6 = scmp.ne.s32.totalorder %s2394_s2, %s3122_s3  ;;  %p3127_p7 = scmp.lt.s32.totalorder %s2394_s2, %s2394_s2 }
  0x86   :  { %p3128_p8 = scmp.lt.s32.totalorder %s3122_s3, %s3122_s3 }
  0x88   :  { %p3129_p9 = por %p3128_p8, %p3127_p7 }
  0x89   :  { %v139_v5 = vld [vmem:[#allocation2] sm:$0xff]  ;;  %v140_v6 = vld [vmem:[#allocation2 + $0x8] sm:$0x3]  ;;  %v141_v9 = vld [vmem:[#allocation2 + $0x10] sm:$0xff] }
  0x8a   :  { %2556 = vmatprep.mubr.msk.f32.mxu0 %vm129_vm0, %v139_v5  ;;  %v242_v8 = vrot.slane %v139_v5, 1  ;;  %v243_v10 = vrot.slane %v140_v6, 1  ;;  %v142_v11 = vld [vmem:[#allocation2 + $0x18] sm:$0x3]  ;;  %v245_v12 = vrot.slane %v141_v9, 1  ;;  %v335_v15 = vrot.slane %v139_v5, 2  ;;  %p3130_p10 = pnand %p3129_p9, %p3123_p6 }
  0x8b   :  { %2557 = vmatmul.mubr.msk.f32.vlgmr.msra.gmra.mrb[0].mxu0 %vm129_vm0, %v141_v9  ;;  %v246_v14 = vrot.slane %v142_v11, 1  ;;  %v336_v16 = vrot.slane %v140_v6, 2  ;;  %v338_v19 = vrot.slane %v141_v9, 2  ;;  %v339_v20 = vrot.slane %v142_v11, 2 }
  0x8c   :  { %2560 = vmatpush3.msk.msra.mxu0 %vm158_vm2, %v249_v3  ;;  %v244_v13 = vsel %vm241_vm3, %v242_v8, %v243_v10 }
  0x8d   :  { %2561 = vmatprep.mubr.msk.f32.mxu0 %vm129_vm0, %v244_v13  ;;  %2564 = vmatprep.subr.msk.mxu0 %vm158_vm2, %v342_v7  ;;  %v247_v17 = vsel %vm241_vm3, %v245_v12, %v246_v14  ;;  %v337_v18 = vsel %vm334_vm4, %v335_v15, %v336_v16  ;;  %v340_v21 = vsel %vm334_vm4, %v338_v19, %v339_v20  ;;  %v2430_v13 = vld [vmem:[#allocation7] ss:$0 sm:$0xff] }
  0x93   :  { %2562 = vmatmul.mubr.msk.f32.vlgmr.msra.gmra.mrb[0].mxu0 %vm129_vm0, %v247_v17 }
  0x94   :  { %2565 = vmatpush3.msk.msra.mxu0 %vm158_vm2, %v342_v7  ;;  %2566 = vmatprep.mubr.msk.f32.mxu0 %vm129_vm0, %v337_v18 }
  0x95   :  { %2749 = vmatprep.subr.bf16.mxu0 %v2748_v61 }
  0x9b   :  { %2567 = vmatmul.mubr.msk.f32.vlgmr.msra.gmra.mrb[0].mxu0 %vm129_vm0, %v340_v21 }
  0x9c   :  { %2751 = vmatpush3.bf16.msra.mxu0 %v2748_v61 }
  0x9d   :  { %2758 = vmatprep.subr.bf16.mxu0 %v3187_v51 }
 0x16e   :  { %v2568_v29 = vpop.f32.mrb[0].mxu0 }
 0x16f   :  { %v2827_v30 = vadd.f32 %v2568_v29, %v2409_v28  ;;  %v416_v31 = vpop.f32.mrb[1].mxu0 }
 0x170   :  { %v2828_v32 = vadd.f32 %v2409_v28, %v416_v31 }
 0x171   :  { %v428_v33 = vmax.f32 %v2827_v30, 0.0 }
 0x172   :  { %v427_v34 = vmax.f32 %v2828_v32, 0.0 }
 0x173   :  { %436 = vst.msk [vmem:[#allocation3 + $0x11] sm:$0xff] %vm429_vm5, %v428_v33 }
 0x174   :  { %435 = vst.msk [vmem:[#allocation3 + $0x1] sm:$0xff] %vm429_vm5, %v427_v34 }
 0x17a   :  { %v439_v41 = vld [vmem:[#allocation3 + $0x10] sm:$0xff]  ;;  %v440_v43 = vld [vmem:[#allocation3 + $0x18] sm:$0x3] }
 0x17b   :  { %v437_v37 = vld [vmem:[#allocation3] sm:$0xff]  ;;  %v438_v38 = vld [vmem:[#allocation3 + $0x8] sm:$0x3]  ;;  %v539_v45 = vrot.slane %v439_v41, 1  ;;  %v540_v46 = vrot.slane %v440_v43, 1  ;;  %v629_v54 = vrot.slane %v439_v41, 2 }
 0x17c   :  { %2573 = vmatprep.mubr.msk.f32.mxu1 %vm429_vm5, %v437_v37  ;;  %v536_v40 = vrot.slane %v437_v37, 1  ;;  %v537_v42 = vrot.slane %v438_v38, 1  ;;  %v626_v47 = vrot.slane %v437_v37, 2  ;;  %v627_v48 = vrot.slane %v438_v38, 2 }
 0x17d   :  { %2574 = vmatmul.mubr.msk.f32.vlgmr.msra.gmra.mrb[0].mxu1 %vm429_vm5, %v439_v41  ;;  %v541_v49 = vsel %vm241_vm3, %v539_v45, %v540_v46  ;;  %v630_v55 = vrot.slane %v440_v43, 2 }
 0x17e   :  { %2743 = vmatpush3.bf16.msra.mxu1 %v2740_v27  ;;  %v538_v44 = vsel %vm241_vm3, %v536_v40, %v537_v42  ;;  %v628_v50 = vsel %vm334_vm4, %v626_v47, %v627_v48 }
 0x17f   :  { %2580 = vmatprep.mubr.msk.f32.mxu1 %vm429_vm5, %v538_v44  ;;  %2745 = vmatprep.subr.bf16.mxu1 %v2744_v39  ;;  %v631_v57 = vsel %vm334_vm4, %v629_v54, %v630_v55 }
 0x185   :  { %2581 = vmatmul.mubr.msk.f32.vlgmr.msra.gmra.mrb[0].mxu1 %vm429_vm5, %v541_v49 }
 0x186   :  { %2747 = vmatpush3.bf16.msra.mxu1 %v2744_v39  ;;  %2587 = vmatprep.mubr.msk.f32.mxu1 %vm429_vm5, %v628_v50 }
 0x187   :  { %2752 = vmatprep.subr.bf16.mxu1 %v3187_v51 }
 0x18d   :  { %2588 = vmatmul.mubr.msk.f32.vlgmr.msra.gmra.mrb[0].mxu1 %vm429_vm5, %v631_v57 }
 0x18e   :  { %2754 = vmatpush3.bf16.msra.mxu1 %v3433_v56  ;;  %2605 = vmatprep.mubr.msk.f32.mxu1 %vm3188_vm7, %v3186_v0 }
 0x18f   :  { %2755 = vmatprep.subr.bf16.mxu1 %v3187_v51 }
 0x192   :  { %2757 = vmatpush3.bf16.msra.mxu1 %v3451_v63 }
 0x193   :  { %2764 = vmatprep.subr.bf16.mxu1 %v3187_v51 }
 0x195   :  { %2606 = vmatmul.mubr.f32.vlgmr.msra.gmra.mrb[2].mxu1 %v3186_v0 }
 0x196   :  { %2766 = vmatpush3.bf16.msra.mxu1 %v3433_v56  ;;  %2627 = vmatprep.mubr.msk.f32.mxu1 %vm3188_vm7, %v3186_v0 }
 0x197   :  { %2767 = vmatprep.subr.bf16.mxu1 %v3187_v51 }
 0x19a   :  { %2769 = vmatpush3.bf16.msra.mxu1 %v3451_v63 }
 0x19b   :  { %2776 = vmatprep.subr.bf16.mxu1 %v3187_v51 }
 0x260   :  { %v2589_v2 = vpop.f32.mrb[0].mxu1 }
 0x261   :  { %v2829_v3 = vadd.f32 %v2589_v2, %v2419_v1  ;;  %v705_v4 = vpop.f32.mrb[1].mxu1 }
 0x262   :  { %v2830_v5 = vadd.f32 %v2419_v1, %v705_v4 }
 0x263   :  { %v717_v6 = vmax.f32 %v2829_v3, 0.0 }
 0x264   :  { %v716_v7 = vmax.f32 %v2830_v5, 0.0 }
 0x265   :  { %v1928_v8 = vrot.slane %v717_v6, 6 }
 0x266   :  { %v1927_v9 = vrot.slane %v716_v7, 7  ;;  %2594 = vmatprep.mubr.msk.f32.mxu0 %vm429_vm5, %v716_v7 }
 0x267   :  { %2595 = vmatmul.mubr.msk.f32.vlgmr.msra.gmra.mrb[2].mxu0 %vm429_vm5, %v717_v6 }
 0x268   :  { %2760 = vmatpush3.bf16.msra.mxu0 %v3433_v56  ;;  %2616 = vmatprep.mubr.msk.f32.mxu0 %vm3188_vm7, %v3186_v0  ;;  %v3474_v10 = vsel %vm943_vm8, %v1928_v8, %v1927_v9  ;;  %v882_v11 = vpop.f32.mrb[2].mxu1 }
 0x269   :  { %2761 = vmatprep.subr.bf16.mxu0 %v3187_v51  ;;  %v2607_v12 = vpop.f32.mrb[3].mxu1  ;;  %v887_v14 = vrot.slane %v882_v11, 1 }
 0x26c   :  { %2763 = vmatpush3.bf16.msra.mxu0 %v3451_v63 }
 0x26d   :  { %2770 = vmatprep.subr.bf16.mxu0 %v3187_v51 }
 0x33a   :  { %v2596_v15 = vpop.f32.mrb[2].mxu0 }
 0x33b   :  { %v3479_v16 = vadd.f32 %v2596_v15, %v2430_v13  ;;  %v799_v17 = vpop.f32.mrb[3].mxu0 }
 0x33c   :  { %v3481_v18 = vadd.f32 %v2430_v13, %v799_v17 }
 0x33d   :  { %v891_v19 = vadd.f32 %v887_v14, %v3479_v16 }
 0x33e   :  { %v890_v20 = vadd.f32 %v882_v11, %v3481_v18 }
 0x33f   :  { %2854 = vtanh.f32 %v891_v19  ;;  %v2434_v23 = vmul.f32 -1.442695, %v891_v19 }
 0x340   :  { %2856 = vtanh.f32 %v890_v20  ;;  %v2433_v24 = vmul.f32 -1.442695, %v890_v20 }
 0x341   :  { %2858 = vpow2.f32 %v2434_v23 }
 0x342   :  { %2860 = vpow2.f32 %v2433_v24 }
 0x349   :  { %v2855_v21 = vpop.eup %2854 }
 0x34a   :  { %912 = vrot.lane.b32.xlu0 %v2855_v21, %s3181_s11  ;;  %v2857_v22 = vpop.eup %2856 }
 0x34b   :  { %v2859_v25 = vpop.eup %2858 }
 0x34c   :  { %v899_v26 = vadd.f32 1.0, %v2859_v25  ;;  %v2861_v27 = vpop.eup %2860 }
 0x34d   :  { %v898_v28 = vadd.f32 1.0, %v2861_v27 }
 0x34e   :  { %910 = vrot.lane.b32.xlu0 %v2857_v22, %s3181_s11  ;;  %2862 = vrcp.f32 %v899_v26 }
 0x34f   :  { %2864 = vrcp.f32 %v898_v28 }
 0x358   :  { %v2863_v29 = vpop.eup %2862 }
 0x359   :  { %v2865_v32 = vpop.eup %2864  ;;  %v907_v35 = vmul.f32 0.0, %v2863_v29 }
 0x35a   :  { %v906_v38 = vmul.f32 0.0, %v2865_v32 }
 0x3bc   :  { %v913_v30 = vpop.permute.xlu0 %912 }
 0x3bd   :  { %v917_v31 = vmul.f32 %v2863_v29, %v913_v30 }
 0x3bf   :  { %922 = vrot.lane.b32.xlu1 %v917_v31, %s3189_s4 }
 0x3c0   :  { %v911_v33 = vpop.permute.xlu0 %910 }
 0x3c1   :  { %v916_v34 = vmul.f32 %v2865_v32, %v911_v33 }
 0x3c3   :  { %920 = vrot.lane.b32.xlu1 %v916_v34, %s3189_s4 }
 0x431   :  { %v923_v36 = vpop.permute.xlu1 %922 }
 0x432   :  { %v927_v37 = vadd.f32 %v923_v36, %v907_v35 }
 0x434   :  { %2866 = vtanh.f32 %v927_v37  ;;  %v1042_v9 = vrot.slane %v927_v37, 7 }
 0x435   :  { %v921_v39 = vpop.permute.xlu1 %920 }
 0x436   :  { %v926_v40 = vadd.f32 %v921_v39, %v906_v38 }
 0x438   :  { %2868 = vtanh.f32 %v926_v40  ;;  %v1041_v12 = vrot.slane %v926_v40, 7 }
 0x43e   :  { %v2867_v41 = vpop.eup %2866 }
 0x43f   :  { %934 = vrot.lane.b32.xlu0 %v2867_v41, %s3181_s11 }
 0x442   :  { %v2869_v42 = vpop.eup %2868 }
 0x443   :  { %932 = vrot.lane.b32.xlu1 %v2869_v42, %s3181_s11 }
 0x4b1   :  { %v935_v43 = vpop.permute.xlu0 %934 }
 0x4b2   :  { %v939_v44 = vmul.f32 %v2863_v29, %v935_v43 }
 0x4b4   :  { %v942_v46 = vrot.slane %v939_v44, 7 }
 0x4b5   :  { %v933_v45 = vpop.permute.xlu1 %932 }
 0x4b6   :  { %v938_v47 = vmul.f32 %v2865_v32, %v933_v45 }
 0x4b8   :  { %v944_v48 = vsel %vm943_vm8, %v942_v46, %v938_v47 }
 0x4b9   :  { %945 = vrot.lane.b32.xlu0 %v944_v48, %s3189_s4 }
 0x52b   :  { %v946_v49 = vpop.permute.xlu0 %945 }
 0x52c   :  { %2617 = vmatmul.mubr.msk.f32.vlgmr.msra.gmra.mrb[4].mxu0 %vm812_vm9, %v946_v49 }
 0x52d   :  { %2772 = vmatpush3.bf16.msra.mxu0 %v3433_v56  ;;  %2638 = vmatprep.mubr.msk.f32.mxu0 %vm3188_vm7, %v3186_v0 }
 0x52e   :  { %2773 = vmatprep.subr.bf16.mxu0 %v3187_v51 }
 0x531   :  { %2775 = vmatpush3.bf16.msra.mxu0 %v3451_v63 }
 0x532   :  { %2782 = vmatprep.subr.bf16.mxu0 %v3187_v51 }
 0x5ff   :  { %v1015_v50 = vpop.f32.mrb[4].mxu0 }
 0x600   :  { %v1020_v52 = vrot.slane %v1015_v50, 7  ;;  %v1024_v53 = vadd.f32 %v1015_v50, %v3479_v16  ;;  %v2618_v54 = vpop.f32.mrb[5].mxu0 }
 0x602   :  { %v1023_v55 = vadd.f32 %v1020_v52, %v3481_v18  ;;  %2870 = vtanh.f32 %v1024_v53  ;;  %v2437_v59 = vmul.f32 -1.442695, %v1024_v53 }
 0x604   :  { %2872 = vtanh.f32 %v1023_v55  ;;  %v2436_v60 = vmul.f32 -1.442695, %v1023_v55 }
 0x605   :  { %2874 = vpow2.f32 %v2437_v59 }
 0x606   :  { %2876 = vpow2.f32 %v2436_v60 }
 0x60c   :  { %v2871_v57 = vpop.eup %2870 }
 0x60d   :  { %1051 = vrot.lane.b32.xlu0 %v2871_v57, %s3181_s11 }
 0x60e   :  { %v2873_v58 = vpop.eup %2872 }
 0x60f   :  { %1049 = vrot.lane.b32.xlu1 %v2873_v58, %s3181_s11  ;;  %v2875_v61 = vpop.eup %2874 }
 0x610   :  { %v2877_v62 = vpop.eup %2876  ;;  %v1032_v1 = vadd.f32 1.0, %v2875_v61 }
 0x611   :  { %v1031_v2 = vadd.f32 1.0, %v2877_v62 }
 0x612   :  { %2878 = vrcp.f32 %v1032_v1 }
 0x613   :  { %2880 = vrcp.f32 %v1031_v2 }
 0x61c   :  { %v2879_v3 = vpop.eup %2878 }
 0x61d   :  { %v2881_v6 = vpop.eup %2880  ;;  %v1046_v11 = vmul.f32 %v2879_v3, %v1042_v9 }
 0x61e   :  { %v1045_v15 = vmul.f32 %v2881_v6, %v1041_v12 }
 0x67f   :  { %v1052_v4 = vpop.permute.xlu0 %1051 }
 0x680   :  { %v1056_v5 = vmul.f32 %v2879_v3, %v1052_v4 }
 0x681   :  { %v1050_v7 = vpop.permute.xlu1 %1049 }
 0x682   :  { %1061 = vrot.lane.b32.xlu0 %v1056_v5, %s3189_s4  ;;  %v1055_v8 = vmul.f32 %v2881_v6, %v1050_v7 }
 0x684   :  { %1059 = vrot.lane.b32.xlu1 %v1055_v8, %s3189_s4 }
 0x6f4   :  { %v1062_v13 = vpop.permute.xlu0 %1061 }
 0x6f5   :  { %v1066_v14 = vadd.f32 %v1062_v13, %v1046_v11 }
 0x6f6   :  { %v1060_v17 = vpop.permute.xlu1 %1059 }
 0x6f7   :  { %2882 = vtanh.f32 %v1066_v14  ;;  %v1065_v19 = vadd.f32 %v1060_v17, %v1045_v15  ;;  %v1181_v50 = vrot.slane %v1066_v14, 7 }
 0x6f9   :  { %2884 = vtanh.f32 %v1065_v19  ;;  %v1180_v49 = vrot.slane %v1065_v19, 7 }
 0x701   :  { %v2883_v20 = vpop.eup %2882 }
 0x702   :  { %1073 = vrot.lane.b32.xlu0 %v2883_v20, %s3181_s11 }
 0x703   :  { %v2885_v21 = vpop.eup %2884 }
 0x704   :  { %1071 = vrot.lane.b32.xlu1 %v2885_v21, %s3181_s11 }
 0x774   :  { %v1074_v22 = vpop.permute.xlu0 %1073 }
 0x775   :  { %v1078_v25 = vmul.f32 %v2879_v3, %v1074_v22 }
 0x776   :  { %v1072_v23 = vpop.permute.xlu1 %1071 }
 0x777   :  { %v1077_v24 = vmul.f32 %v2881_v6, %v1072_v23 }
 0x779   :  { %v1081_v26 = vrot.slane %v1077_v24, 1 }
 0x77b   :  { %v1082_v27 = vsel %vm943_vm8, %v1078_v25, %v1081_v26 }
 0x77c   :  { %1083 = vrot.lane.b32.xlu1 %v1082_v27, %s3189_s4 }
 0x7ee   :  { %v1084_v28 = vpop.permute.xlu1 %1083 }
 0x7ef   :  { %2628 = vmatmul.mubr.msk.f32.vlgmr.msra.gmra.mrb[4].mxu1 %vm812_vm9, %v1084_v28 }
 0x7f0   :  { %2778 = vmatpush3.bf16.msra.mxu1 %v3433_v56  ;;  %2649 = vmatprep.mubr.msk.f32.mxu1 %vm3188_vm7, %v3186_v0 }
 0x7f1   :  { %2779 = vmatprep.subr.bf16.mxu1 %v3187_v51 }
 0x7f4   :  { %2781 = vmatpush3.bf16.msra.mxu1 %v3451_v63 }
 0x7f5   :  { %2788 = vmatprep.subr.bf16.mxu1 %v3187_v51 }
 0x8c2   :  { %v1153_v29 = vpop.f32.mrb[4].mxu1 }
 0x8c3   :  { %v1158_v30 = vrot.slane %v1153_v29, 6  ;;  %v1159_v31 = vrot.slane %v1153_v29, 7  ;;  %v2629_v32 = vpop.f32.mrb[5].mxu1 }
 0x8c5   :  { %v1162_v33 = vadd.f32 %v1158_v30, %v3481_v18  ;;  %v1163_v34 = vadd.f32 %v1159_v31, %v3479_v16 }
 0x8c7   :  { %2886 = vtanh.f32 %v1162_v33  ;;  %v2439_v37 = vmul.f32 -1.442695, %v1162_v33  ;;  %v2440_v38 = vmul.f32 -1.442695, %v1163_v34 }
 0x8c8   :  { %2888 = vtanh.f32 %v1163_v34 }
 0x8c9   :  { %2890 = vpow2.f32 %v2439_v37 }
 0x8ca   :  { %2892 = vpow2.f32 %v2440_v38 }
 0x8d1   :  { %v2887_v35 = vpop.eup %2886 }
 0x8d2   :  { %v2889_v36 = vpop.eup %2888  ;;  %1188 = vrot.lane.b32.xlu0 %v2887_v35, %s3181_s11 }
 0x8d3   :  { %1190 = vrot.lane.b32.xlu1 %v2889_v36, %s3181_s11  ;;  %v2891_v39 = vpop.eup %2890 }
 0x8d4   :  { %v2893_v40 = vpop.eup %2892  ;;  %v1170_v41 = vadd.f32 1.0, %v2891_v39 }
 0x8d5   :  { %v1171_v42 = vadd.f32 1.0, %v2893_v40 }
 0x8d6   :  { %2894 = vrcp.f32 %v1170_v41 }
 0x8d7   :  { %2896 = vrcp.f32 %v1171_v42 }
 0x8e0   :  { %v2895_v43 = vpop.eup %2894 }
 0x8e1   :  { %v2897_v45 = vpop.eup %2896  ;;  %v1184_v52 = vmul.f32 %v2895_v43, %v1180_v49 }
 0x8e2   :  { %v1185_v53 = vmul.f32 %v2897_v45, %v1181_v50 }
 0x944   :  { %v1189_v44 = vpop.permute.xlu0 %1188 }
 0x945   :  { %v1191_v46 = vpop.permute.xlu1 %1190  ;;  %v1194_v47 = vmul.f32 %v2895_v43, %v1189_v44 }
 0x946   :  { %v1195_v48 = vmul.f32 %v2897_v45, %v1191_v46 }
 0x947   :  { %1198 = vrot.lane.b32.xlu0 %v1194_v47, %s3189_s4 }
 0x948   :  { %1200 = vrot.lane.b32.xlu1 %v1195_v48, %s3189_s4 }
 0x9b9   :  { %v1199_v54 = vpop.permute.xlu0 %1198 }
 0x9ba   :  { %v1201_v55 = vpop.permute.xlu1 %1200  ;;  %v1204_v57 = vadd.f32 %v1199_v54, %v1184_v52 }
 0x9bb   :  { %v1205_v58 = vadd.f32 %v1201_v55, %v1185_v53 }
 0x9bc   :  { %2898 = vtanh.f32 %v1204_v57  ;;  %v1320_v30 = vrot.slane %v1204_v57, 7 }
 0x9bd   :  { %2900 = vtanh.f32 %v1205_v58  ;;  %v1321_v31 = vrot.slane %v1205_v58, 7 }
 0x9c6   :  { %v2899_v59 = vpop.eup %2898 }
 0x9c7   :  { %v2901_v60 = vpop.eup %2900  ;;  %1210 = vrot.lane.b32.xlu0 %v2899_v59, %s3181_s11 }
 0x9c8   :  { %1212 = vrot.lane.b32.xlu1 %v2901_v60, %s3181_s11 }
 0xa39   :  { %v1211_v61 = vpop.permute.xlu0 %1210 }
 0xa3a   :  { %v1213_v62 = vpop.permute.xlu1 %1212  ;;  %v1216_v1 = vmul.f32 %v2895_v43, %v1211_v61 }
 0xa3b   :  { %v1217_v2 = vmul.f32 %v2897_v45, %v1213_v62 }
 0xa3c   :  { %v1220_v3 = vrot.slane %v1216_v1, 2 }
 0xa3d   :  { %v1221_v4 = vrot.slane %v1217_v2, 1 }
 0xa3f   :  { %v1222_v5 = vsel %vm943_vm8, %v1221_v4, %v1220_v3 }
 0xa40   :  { %1223 = vrot.lane.b32.xlu0 %v1222_v5, %s3189_s4 }
 0xab2   :  { %v1224_v6 = vpop.permute.xlu0 %1223 }
 0xab3   :  { %2639 = vmatmul.mubr.msk.f32.vlgmr.msra.gmra.mrb[6].mxu0 %vm812_vm9, %v1224_v6 }
 0xab4   :  { %2784 = vmatpush3.bf16.msra.mxu0 %v3433_v56  ;;  %2660 = vmatprep.mubr.msk.f32.mxu0 %vm3188_vm7, %v3186_v0 }
 0xab5   :  { %2785 = vmatprep.subr.bf16.mxu0 %v3187_v51 }
 0xab8   :  { %2787 = vmatpush3.bf16.msra.mxu0 %v3451_v63 }
 0xab9   :  { %2794 = vmatprep.subr.bf16.mxu0 %v3187_v51 }
 0xb86   :  { %v1293_v7 = vpop.f32.mrb[6].mxu0 }
 0xb87   :  { %v1298_v8 = vrot.slane %v1293_v7, 5  ;;  %v1299_v9 = vrot.slane %v1293_v7, 6  ;;  %v2640_v11 = vpop.f32.mrb[7].mxu0 }
 0xb89   :  { %v1302_v12 = vadd.f32 %v1298_v8, %v3481_v18  ;;  %v1303_v13 = vadd.f32 %v1299_v9, %v3479_v16 }
 0xb8b   :  { %2902 = vtanh.f32 %v1302_v12  ;;  %v2442_v17 = vmul.f32 -1.442695, %v1302_v12  ;;  %v2443_v19 = vmul.f32 -1.442695, %v1303_v13 }
 0xb8c   :  { %2904 = vtanh.f32 %v1303_v13 }
 0xb8d   :  { %2906 = vpow2.f32 %v2442_v17 }
 0xb8e   :  { %2908 = vpow2.f32 %v2443_v19 }
 0xb95   :  { %v2903_v14 = vpop.eup %2902 }
 0xb96   :  { %v2905_v15 = vpop.eup %2904  ;;  %1328 = vrot.lane.b32.xlu1 %v2903_v14, %s3181_s11 }
 0xb97   :  { %1330 = vrot.lane.b32.xlu0 %v2905_v15, %s3181_s11  ;;  %v2907_v20 = vpop.eup %2906 }
 0xb98   :  { %v2909_v21 = vpop.eup %2908  ;;  %v1310_v22 = vadd.f32 1.0, %v2907_v20 }
 0xb99   :  { %v1311_v23 = vadd.f32 1.0, %v2909_v21 }
 0xb9a   :  { %2910 = vrcp.f32 %v1310_v22 }
 0xb9b   :  { %2912 = vrcp.f32 %v1311_v23 }
 0xba4   :  { %v2911_v24 = vpop.eup %2910 }
 0xba5   :  { %v2913_v26 = vpop.eup %2912  ;;  %v1324_v32 = vmul.f32 %v2911_v24, %v1320_v30 }
 0xba6   :  { %v1325_v33 = vmul.f32 %v2913_v26, %v1321_v31 }
 0xc08   :  { %v1329_v25 = vpop.permute.xlu1 %1328 }
 0xc09   :  { %v1331_v27 = vpop.permute.xlu0 %1330  ;;  %v1334_v28 = vmul.f32 %v2911_v24, %v1329_v25 }
 0xc0a   :  { %v1335_v29 = vmul.f32 %v2913_v26, %v1331_v27 }
 0xc0b   :  { %1338 = vrot.lane.b32.xlu1 %v1334_v28, %s3189_s4 }
 0xc0c   :  { %1340 = vrot.lane.b32.xlu0 %v1335_v29, %s3189_s4 }
 0xc7d   :  { %v1339_v34 = vpop.permute.xlu1 %1338 }
 0xc7e   :  { %v1341_v35 = vpop.permute.xlu0 %1340  ;;  %v1344_v36 = vadd.f32 %v1339_v34, %v1324_v32 }
 0xc7f   :  { %v1345_v37 = vadd.f32 %v1341_v35, %v1325_v33 }
 0xc80   :  { %2914 = vtanh.f32 %v1344_v36  ;;  %v1460_v8 = vrot.slane %v1344_v36, 7 }
 0xc81   :  { %2916 = vtanh.f32 %v1345_v37  ;;  %v1461_v9 = vrot.slane %v1345_v37, 7 }
 0xc8a   :  { %v2915_v38 = vpop.eup %2914 }
 0xc8b   :  { %v2917_v39 = vpop.eup %2916  ;;  %1350 = vrot.lane.b32.xlu1 %v2915_v38, %s3181_s11 }
 0xc8c   :  { %1352 = vrot.lane.b32.xlu0 %v2917_v39, %s3181_s11 }
 0xcfd   :  { %v1351_v40 = vpop.permute.xlu1 %1350 }
 0xcfe   :  { %v1353_v41 = vpop.permute.xlu0 %1352  ;;  %v1356_v42 = vmul.f32 %v2911_v24, %v1351_v40 }
 0xcff   :  { %v1357_v43 = vmul.f32 %v2913_v26, %v1353_v41 }
 0xd00   :  { %v1360_v44 = vrot.slane %v1356_v42, 3 }
 0xd01   :  { %v1361_v45 = vrot.slane %v1357_v43, 2 }
 0xd03   :  { %v1362_v46 = vsel %vm943_vm8, %v1361_v45, %v1360_v44 }
 0xd04   :  { %1363 = vrot.lane.b32.xlu1 %v1362_v46, %s3189_s4 }
 0xd76   :  { %v1364_v47 = vpop.permute.xlu1 %1363 }
 0xd77   :  { %2650 = vmatmul.mubr.msk.f32.vlgmr.msra.gmra.mrb[6].mxu1 %vm812_vm9, %v1364_v47 }
 0xd78   :  { %2790 = vmatpush3.bf16.msra.mxu1 %v3433_v56  ;;  %2671 = vmatprep.mubr.msk.f32.mxu1 %vm3188_vm7, %v3186_v0 }
 0xd79   :  { %2791 = vmatprep.subr.bf16.mxu1 %v3187_v51 }
 0xd7c   :  { %2793 = vmatpush3.bf16.msra.mxu1 %v3451_v63 }
 0xd7d   :  { %2800 = vmatprep.subr.bf16.mxu1 %v3187_v51 }
 0xe4a   :  { %v1433_v48 = vpop.f32.mrb[6].mxu1 }
 0xe4b   :  { %v1438_v49 = vrot.slane %v1433_v48, 4  ;;  %v1439_v50 = vrot.slane %v1433_v48, 5  ;;  %v2651_v52 = vpop.f32.mrb[7].mxu1 }
 0xe4d   :  { %v1442_v53 = vadd.f32 %v1438_v49, %v3481_v18  ;;  %v1443_v54 = vadd.f32 %v1439_v50, %v3479_v16 }
 0xe4f   :  { %2918 = vtanh.f32 %v1442_v53  ;;  %v2445_v58 = vmul.f32 -1.442695, %v1442_v53  ;;  %v2446_v59 = vmul.f32 -1.442695, %v1443_v54 }
 0xe50   :  { %2920 = vtanh.f32 %v1443_v54 }
 0xe51   :  { %2922 = vpow2.f32 %v2445_v58 }
 0xe52   :  { %2924 = vpow2.f32 %v2446_v59 }
 0xe59   :  { %v2919_v55 = vpop.eup %2918 }
 0xe5a   :  { %v2921_v57 = vpop.eup %2920  ;;  %1468 = vrot.lane.b32.xlu0 %v2919_v55, %s3181_s11 }
 0xe5b   :  { %1470 = vrot.lane.b32.xlu1 %v2921_v57, %s3181_s11  ;;  %v2923_v60 = vpop.eup %2922 }
 0xe5c   :  { %v2925_v61 = vpop.eup %2924  ;;  %v1450_v62 = vadd.f32 1.0, %v2923_v60 }
 0xe5d   :  { %v1451_v1 = vadd.f32 1.0, %v2925_v61 }
 0xe5e   :  { %2926 = vrcp.f32 %v1450_v62 }
 0xe5f   :  { %2928 = vrcp.f32 %v1451_v1 }
 0xe68   :  { %v2927_v2 = vpop.eup %2926 }
 0xe69   :  { %v2929_v4 = vpop.eup %2928  ;;  %v1464_v11 = vmul.f32 %v2927_v2, %v1460_v8 }
 0xe6a   :  { %v1465_v12 = vmul.f32 %v2929_v4, %v1461_v9 }
 0xecc   :  { %v1469_v3 = vpop.permute.xlu0 %1468 }
 0xecd   :  { %v1471_v5 = vpop.permute.xlu1 %1470  ;;  %v1474_v6 = vmul.f32 %v2927_v2, %v1469_v3 }
 0xece   :  { %v1475_v7 = vmul.f32 %v2929_v4, %v1471_v5  ;;  %v1919_v5 = vld [vmem:[%s3718_s8 + $0x8] sm:$0xff] }
 0xecf   :  { %1478 = vrot.lane.b32.xlu0 %v1474_v6, %s3189_s4 }
 0xed0   :  { %1480 = vrot.lane.b32.xlu1 %v1475_v7, %s3189_s4 }
 0xf41   :  { %v1479_v13 = vpop.permute.xlu0 %1478 }
 0xf42   :  { %v1481_v14 = vpop.permute.xlu1 %1480  ;;  %v1484_v15 = vadd.f32 %v1479_v13, %v1464_v11 }
 0xf43   :  { %v1485_v17 = vadd.f32 %v1481_v14, %v1465_v12 }
 0xf44   :  { %2930 = vtanh.f32 %v1484_v15  ;;  %v1600_v47 = vrot.slane %v1484_v15, 7 }
 0xf45   :  { %2932 = vtanh.f32 %v1485_v17  ;;  %v1601_v48 = vrot.slane %v1485_v17, 7 }
 0xf4e   :  { %v2931_v19 = vpop.eup %2930 }
 0xf4f   :  { %v2933_v20 = vpop.eup %2932  ;;  %1490 = vrot.lane.b32.xlu0 %v2931_v19, %s3181_s11 }
 0xf50   :  { %1492 = vrot.lane.b32.xlu1 %v2933_v20, %s3181_s11 }
 0xfc1   :  { %v1491_v21 = vpop.permute.xlu0 %1490 }
 0xfc2   :  { %v1493_v22 = vpop.permute.xlu1 %1492  ;;  %v1496_v23 = vmul.f32 %v2927_v2, %v1491_v21 }
 0xfc3   :  { %v1497_v24 = vmul.f32 %v2929_v4, %v1493_v22  ;;  %v1918_v4 = vld [vmem:[%s3718_s8] sm:$0xff] }
 0xfc4   :  { %v1500_v25 = vrot.slane %v1496_v23, 4  ;;  %v2801_v6 = vpack.c.bf16 %v1919_v5, %v1918_v4 }
 0xfc5   :  { %v1501_v26 = vrot.slane %v1497_v24, 3 }
 0xfc7   :  { %v1502_v27 = vsel %vm943_vm8, %v1501_v26, %v1500_v25 }
 0xfc8   :  { %1503 = vrot.lane.b32.xlu0 %v1502_v27, %s3189_s4 }
0x103a   :  { %v1504_v28 = vpop.permute.xlu0 %1503 }
0x103b   :  { %2661 = vmatmul.mubr.msk.f32.vlgmr.msra.gmra.mrb[8].mxu0 %vm812_vm9, %v1504_v28 }
0x103c   :  { %2796 = vmatpush3.bf16.msra.mxu0 %v3433_v56  ;;  %2682 = vmatprep.mubr.msk.f32.mxu0 %vm3188_vm7, %v3186_v0 }
0x103d   :  { %2797 = vmatprep.subr.bf16.mxu0 %v3187_v51 }
0x1040   :  { %2799 = vmatpush3.bf16.msra.mxu0 %v3451_v63 }
0x1041   :  { %2803 = vmatprep.subr.bf16.mxu0 %v3187_v51 }
0x110e   :  { %v1573_v29 = vpop.f32.mrb[8].mxu0 }
0x110f   :  { %v1578_v30 = vrot.slane %v1573_v29, 3  ;;  %v1579_v31 = vrot.slane %v1573_v29, 4  ;;  %v2662_v32 = vpop.f32.mrb[9].mxu0 }
0x1111   :  { %v1582_v33 = vadd.f32 %v1578_v30, %v3481_v18  ;;  %v1583_v34 = vadd.f32 %v1579_v31, %v3479_v16 }
0x1113   :  { %2934 = vtanh.f32 %v1582_v33  ;;  %v2448_v36 = vmul.f32 -1.442695, %v1582_v33  ;;  %v2449_v63 = vmul.f32 -1.442695, %v1583_v34 }
0x1114   :  { %2936 = vtanh.f32 %v1583_v34 }
0x1115   :  { %2938 = vpow2.f32 %v2448_v36 }
0x1116   :  { %2940 = vpow2.f32 %v2449_v63 }
0x111d   :  { %v2935_v56 = vpop.eup %2934 }
0x111e   :  { %v2937_v35 = vpop.eup %2936  ;;  %1608 = vrot.lane.b32.xlu1 %v2935_v56, %s3181_s11 }
0x111f   :  { %1610 = vrot.lane.b32.xlu0 %v2937_v35, %s3181_s11  ;;  %v2939_v37 = vpop.eup %2938 }
0x1120   :  { %v2941_v38 = vpop.eup %2940  ;;  %v1590_v39 = vadd.f32 1.0, %v2939_v37 }
0x1121   :  { %v1591_v40 = vadd.f32 1.0, %v2941_v38 }
0x1122   :  { %2942 = vrcp.f32 %v1590_v39 }
0x1123   :  { %2944 = vrcp.f32 %v1591_v40 }
0x112c   :  { %v2943_v41 = vpop.eup %2942 }
0x112d   :  { %v2945_v43 = vpop.eup %2944  ;;  %v1604_v49 = vmul.f32 %v2943_v41, %v1600_v47 }
0x112e   :  { %v1605_v50 = vmul.f32 %v2945_v43, %v1601_v48 }
0x1190   :  { %v1609_v42 = vpop.permute.xlu1 %1608 }
0x1191   :  { %v1611_v44 = vpop.permute.xlu0 %1610  ;;  %v1614_v45 = vmul.f32 %v2943_v41, %v1609_v42 }
0x1192   :  { %v1615_v46 = vmul.f32 %v2945_v43, %v1611_v44 }
0x1193   :  { %1618 = vrot.lane.b32.xlu1 %v1614_v45, %s3189_s4 }
0x1194   :  { %1620 = vrot.lane.b32.xlu0 %v1615_v46, %s3189_s4 }
0x1205   :  { %v1619_v52 = vpop.permute.xlu1 %1618 }
0x1206   :  { %v1621_v53 = vpop.permute.xlu0 %1620  ;;  %v1624_v54 = vadd.f32 %v1619_v52, %v1604_v49 }
0x1207   :  { %v1625_v55 = vadd.f32 %v1621_v53, %v1605_v50 }
0x1208   :  { %2946 = vtanh.f32 %v1624_v54  ;;  %v1740_v32 = vrot.slane %v1624_v54, 7 }
0x1209   :  { %2948 = vtanh.f32 %v1625_v55  ;;  %v1741_v33 = vrot.slane %v1625_v55, 7 }
0x1212   :  { %v2947_v57 = vpop.eup %2946 }
0x1213   :  { %v2949_v58 = vpop.eup %2948  ;;  %1630 = vrot.lane.b32.xlu1 %v2947_v57, %s3181_s11 }
0x1214   :  { %1632 = vrot.lane.b32.xlu0 %v2949_v58, %s3181_s11 }
0x1285   :  { %v1631_v59 = vpop.permute.xlu1 %1630 }
0x1286   :  { %v1633_v60 = vpop.permute.xlu0 %1632  ;;  %v1636_v61 = vmul.f32 %v2943_v41, %v1631_v59 }
0x1287   :  { %v1637_v62 = vmul.f32 %v2945_v43, %v1633_v60 }
0x1288   :  { %v1640_v1 = vrot.slane %v1636_v61, 5 }
0x1289   :  { %v1641_v2 = vrot.slane %v1637_v62, 4 }
0x128b   :  { %v1642_v3 = vsel %vm943_vm8, %v1641_v2, %v1640_v1  ;;  %v2456_v2 = vld [vmem:[#allocation9] ss:$0 sm:$0xff] }
0x128c   :  { %1643 = vrot.lane.b32.xlu1 %v1642_v3, %s3189_s4 }
0x12fe   :  { %v1644_v7 = vpop.permute.xlu1 %1643 }
0x12ff   :  { %2672 = vmatmul.mubr.msk.f32.vlgmr.msra.gmra.mrb[8].mxu1 %vm812_vm9, %v1644_v7 }
0x1300   :  { %2802 = vmatpush3.bf16.msra.mxu1 %v2801_v6  ;;  %2689 = vmatprep.mubr.msk.f32.mxu1 %vm3188_vm7, %v3186_v0 }
0x1301   :  { %2809 = vmatprep.subr.bf16.mxu1 %v3187_v51 }
0x1303   :  { %2690 = vmatmul.mubr.msk.f32.vlgmr.msra.gmra.mrb[10].mxu1 %vm429_vm5, %v3474_v10 }
0x1304   :  { %2711 = vmatprep.mubr.msk.f32.mxu1 %vm3188_vm7, %v3186_v0 }
0x13d2   :  { %v1713_v8 = vpop.f32.mrb[8].mxu1 }
0x13d3   :  { %v1718_v9 = vrot.slane %v1713_v8, 2  ;;  %v1719_v11 = vrot.slane %v1713_v8, 3  ;;  %v2673_v12 = vpop.f32.mrb[9].mxu1 }
0x13d5   :  { %v1722_v13 = vadd.f32 %v1718_v9, %v3481_v18  ;;  %v1723_v14 = vadd.f32 %v1719_v11, %v3479_v16 }
0x13d6   :  { %v3594_v15 = vpop.f32.mrb[10].mxu1 }
0x13d7   :  { %2950 = vtanh.f32 %v1722_v13  ;;  %v2691_v17 = vpop.f32.mrb[11].mxu1  ;;  %v2451_v10 = vmul.f32 -1.442695, %v1722_v13  ;;  %v2452_v21 = vmul.f32 -1.442695, %v1723_v14 }
0x13d8   :  { %2952 = vtanh.f32 %v1723_v14 }
0x13d9   :  { %2954 = vpow2.f32 %v2451_v10 }
0x13da   :  { %2956 = vpow2.f32 %v2452_v21 }
0x13e1   :  { %v2951_v19 = vpop.eup %2950 }
0x13e2   :  { %v2953_v20 = vpop.eup %2952  ;;  %1748 = vrot.lane.b32.xlu0 %v2951_v19, %s3181_s11 }
0x13e3   :  { %1750 = vrot.lane.b32.xlu1 %v2953_v20, %s3181_s11  ;;  %v2955_v22 = vpop.eup %2954 }
0x13e4   :  { %v2957_v23 = vpop.eup %2956  ;;  %v1730_v24 = vadd.f32 1.0, %v2955_v22 }
0x13e5   :  { %v1731_v25 = vadd.f32 1.0, %v2957_v23 }
0x13e6   :  { %2958 = vrcp.f32 %v1730_v24 }
0x13e7   :  { %2960 = vrcp.f32 %v1731_v25 }
0x13f0   :  { %v2959_v26 = vpop.eup %2958 }
0x13f1   :  { %v2961_v28 = vpop.eup %2960  ;;  %v1744_v34 = vmul.f32 %v2959_v26, %v1740_v32  ;;  %v2041_v32 = vld [vmem:[%s3720_s10 + $0x10] sm:$0xff] }
0x13f2   :  { %v1745_v56 = vmul.f32 %v2961_v28, %v1741_v33  ;;  %v2042_v33 = vld [vmem:[%s3720_s10 + $0x18] sm:$0xff] }
0x1454   :  { %v1749_v27 = vpop.permute.xlu0 %1748 }
0x1455   :  { %v1751_v29 = vpop.permute.xlu1 %1750  ;;  %v1754_v30 = vmul.f32 %v2959_v26, %v1749_v27  ;;  %v2039_v27 = vld [vmem:[%s3720_s10] sm:$0xff] }
0x1456   :  { %v1755_v31 = vmul.f32 %v2961_v28, %v1751_v29  ;;  %v2043_v29 = vld [vmem:[%s3720_s10 + $0x20] sm:$0xff] }
0x1457   :  { %1758 = vrot.lane.b32.xlu0 %v1754_v30, %s3189_s4 }
0x1458   :  { %1760 = vrot.lane.b32.xlu1 %v1755_v31, %s3189_s4  ;;  %v2044_v31 = vld [vmem:[%s3720_s10 + $0x28] sm:$0xff] }
0x14c9   :  { %v1759_v35 = vpop.permute.xlu0 %1758 }
0x14ca   :  { %v1761_v36 = vpop.permute.xlu1 %1760  ;;  %v1764_v63 = vadd.f32 %v1759_v35, %v1744_v34  ;;  %v2045_v35 = vld [vmem:[%s3720_s10 + $0x30] sm:$0xff] }
0x14cb   :  { %v1765_v37 = vadd.f32 %v1761_v36, %v1745_v56  ;;  %v2804_v56 = vpack.c.bf16 %v2044_v31, %v2043_v29  ;;  %v2046_v36 = vld [vmem:[%s3720_s10 + $0x38] sm:$0xff] }
0x14cc   :  { %2962 = vtanh.f32 %v1764_v63  ;;  %v1880_v13 = vrot.slane %v1764_v63, 7  ;;  %v2813_v63 = vpack.c.bf16 %v2042_v33, %v2041_v32 }
0x14cd   :  { %2964 = vtanh.f32 %v1765_v37  ;;  %v1881_v14 = vrot.slane %v1765_v37, 7  ;;  %v2807_v37 = vpack.c.bf16 %v2046_v36, %v2045_v35 }
0x14d6   :  { %v2963_v38 = vpop.eup %2962 }
0x14d7   :  { %v2965_v39 = vpop.eup %2964  ;;  %1770 = vrot.lane.b32.xlu0 %v2963_v38, %s3181_s11 }
0x14d8   :  { %1772 = vrot.lane.b32.xlu1 %v2965_v39, %s3181_s11 }
0x1549   :  { %v1771_v40 = vpop.permute.xlu0 %1770 }
0x154a   :  { %v1773_v41 = vpop.permute.xlu1 %1772  ;;  %v1776_v42 = vmul.f32 %v2959_v26, %v1771_v40 }
0x154b   :  { %v1777_v43 = vmul.f32 %v2961_v28, %v1773_v41  ;;  %v2040_v28 = vld [vmem:[%s3720_s10 + $0x8] sm:$0xff] }
0x154c   :  { %v1780_v44 = vrot.slane %v1776_v42, 6  ;;  %v2810_v30 = vpack.c.bf16 %v2040_v28, %v2039_v27 }
0x154d   :  { %v1781_v45 = vrot.slane %v1777_v43, 5 }
0x154e   :  { %2811 = vmatpush3.bf16.msra.mxu1 %v2810_v30 }
0x154f   :  { %v1782_v46 = vsel %vm943_vm8, %v1781_v45, %v1780_v44  ;;  %2812 = vmatprep.subr.bf16.mxu1 %v3187_v51 }
0x1550   :  { %1783 = vrot.lane.b32.xlu0 %v1782_v46, %s3189_s4 }
0x1552   :  { %2814 = vmatpush3.bf16.msra.mxu1 %v2813_v63 }
0x1553   :  { %2821 = vmatprep.subr.bf16.mxu1 %v3187_v51 }
0x15c2   :  { %v1784_v47 = vpop.permute.xlu0 %1783 }
0x15c3   :  { %2683 = vmatmul.mubr.msk.f32.vlgmr.msra.gmra.mrb[10].mxu0 %vm812_vm9, %v1784_v47 }
0x15c4   :  { %2700 = vmatprep.mubr.msk.f32.mxu0 %vm3188_vm7, %v3186_v0  ;;  %2805 = vmatpush3.bf16.msra.mxu0 %v2804_v56 }
0x15c5   :  { %2806 = vmatprep.subr.bf16.mxu0 %v3187_v51 }
0x15c8   :  { %2808 = vmatpush3.bf16.msra.mxu0 %v2807_v37 }
0x15c9   :  { %2815 = vmatprep.subr.bf16.mxu0 %v3187_v51 }
0x1696   :  { %v1853_v48 = vpop.f32.mrb[10].mxu0 }
0x1697   :  { %v1858_v49 = vrot.slane %v1853_v48, 1  ;;  %v1859_v50 = vrot.slane %v1853_v48, 2  ;;  %v2684_v52 = vpop.f32.mrb[11].mxu0 }
0x1699   :  { %v1862_v53 = vadd.f32 %v1858_v49, %v3481_v18  ;;  %v1863_v54 = vadd.f32 %v1859_v50, %v3479_v16  ;;  %v1999_v16 = vadd.f32 %v2456_v2, %v3594_v15 }
0x169b   :  { %2966 = vtanh.f32 %v1862_v53  ;;  %v2454_v58 = vmul.f32 -1.442695, %v1862_v53  ;;  %v2455_v59 = vmul.f32 -1.442695, %v1863_v54  ;;  %v2458_v9 = vmul.f32 -1.442695, %v1999_v16 }
0x169c   :  { %2968 = vtanh.f32 %v1863_v54  ;;  %v2207_v54 = vld [vmem:[%s3722_s12] sm:$0xff] }
0x169d   :  { %2970 = vpow2.f32 %v2454_v58  ;;  %v2210_v58 = vld [vmem:[%s3722_s12 + $0x18] sm:$0xff] }
0x169e   :  { %2972 = vpow2.f32 %v2455_v59 }
0x16a5   :  { %v2967_v55 = vpop.eup %2966 }
0x16a6   :  { %v2969_v57 = vpop.eup %2968  ;;  %1888 = vrot.lane.b32.xlu1 %v2967_v55, %s3181_s11  ;;  %v2208_v55 = vld [vmem:[%s3722_s12 + $0x8] sm:$0xff] }
0x16a7   :  { %1890 = vrot.lane.b32.xlu0 %v2969_v57, %s3181_s11  ;;  %v2971_v60 = vpop.eup %2970  ;;  %v2816_v57 = vpack.c.bf16 %v2208_v55, %v2207_v54 }
0x16a8   :  { %v2973_v61 = vpop.eup %2972  ;;  %v1870_v62 = vadd.f32 1.0, %v2971_v60  ;;  %v2292_v60 = vld [vmem:[%s3724_s14] sm:$0xff] }
0x16a9   :  { %v1871_v1 = vadd.f32 1.0, %v2973_v61  ;;  %v2293_v61 = vld [vmem:[%s3724_s14 + $0x8] sm:$0xff] }
0x16aa   :  { %2974 = vrcp.f32 %v1870_v62  ;;  %v2822_v62 = vpack.c.bf16 %v2293_v61, %v2292_v60 }
0x16ab   :  { %2976 = vrcp.f32 %v1871_v1 }
0x16ac   :  { %2978 = vtanh.f32 %v1999_v16  ;;  %v2461_v16 = vld [vmem:[#allocation10] ss:$0 sm:$0xff] }
0x16ad   :  { %2980 = vpow2.f32 %v2458_v9 }
0x16b4   :  { %v2975_v18 = vpop.eup %2974 }
0x16b5   :  { %v2977_v4 = vpop.eup %2976  ;;  %v1884_v15 = vmul.f32 %v2975_v18, %v1880_v13 }
0x16b6   :  { %v2979_v8 = vpop.eup %2978  ;;  %v1885_v17 = vmul.f32 %v2977_v4, %v1881_v14 }
0x16b7   :  { %v2981_v11 = vpop.eup %2980 }
0x16b8   :  { %v2005_v12 = vadd.f32 1.0, %v2981_v11 }
0x16ba   :  { %2982 = vrcp.f32 %v2005_v12 }
0x16c4   :  { %v2983_v22 = vpop.eup %2982 }
0x1718   :  { %v1889_v3 = vpop.permute.xlu1 %1888 }
0x1719   :  { %v1891_v5 = vpop.permute.xlu0 %1890  ;;  %v1894_v6 = vmul.f32 %v2975_v18, %v1889_v3 }
0x171a   :  { %v1895_v7 = vmul.f32 %v2977_v4, %v1891_v5 }
0x171b   :  { %1898 = vrot.lane.b32.xlu1 %v1894_v6, %s3189_s4 }
0x171c   :  { %1900 = vrot.lane.b32.xlu0 %v1895_v7, %s3189_s4  ;;  %v2294_v7 = vld [vmem:[%s3724_s14 + $0x10] sm:$0xff] }
0x171f   :  { %2010 = vrot.lane.b32.xlu1 %v2979_v8, %s3181_s11  ;;  %v2295_v8 = vld [vmem:[%s3724_s14 + $0x18] sm:$0xff] }
0x1720   :  { %v2825_v9 = vpack.c.bf16 %v2295_v8, %v2294_v7 }
0x178d   :  { %v1899_v19 = vpop.permute.xlu1 %1898 }
0x178e   :  { %v1901_v20 = vpop.permute.xlu0 %1900  ;;  %v1904_v10 = vadd.f32 %v1899_v19, %v1884_v15 }
0x178f   :  { %v1905_v21 = vadd.f32 %v1901_v20, %v1885_v17 }
0x1790   :  { %2984 = vtanh.f32 %v1904_v10 }
0x1791   :  { %2986 = vtanh.f32 %v1905_v21  ;;  %v2011_v23 = vpop.permute.xlu1 %2010 }
0x1792   :  { %v2013_v24 = vmul.f32 %v2983_v22, %v2011_v23 }
0x1794   :  { %2988 = vtanh.f32 %v2013_v24 }
0x179a   :  { %v2985_v25 = vpop.eup %2984 }
0x179b   :  { %v2987_v26 = vpop.eup %2986  ;;  %1910 = vrot.lane.b32.xlu0 %v2985_v25, %s3181_s11 }
0x179c   :  { %1912 = vrot.lane.b32.xlu1 %v2987_v26, %s3181_s11 }
0x179e   :  { %v2989_v34 = vpop.eup %2988 }
0x179f   :  { %2016 = vrot.lane.b32.xlu0 %v2989_v34, %s3190_s24 }
0x180d   :  { %v1911_v38 = vpop.permute.xlu0 %1910 }
0x180e   :  { %v1913_v39 = vpop.permute.xlu1 %1912  ;;  %v1916_v40 = vmul.f32 %v2975_v18, %v1911_v38 }
0x180f   :  { %v1917_v41 = vmul.f32 %v2977_v4, %v1913_v39 }
0x1810   :  { %v2121_v42 = vrot.slane %v1916_v40, 7 }
0x1811   :  { %v2122_v43 = vrot.slane %v1917_v41, 6  ;;  %v2017_v44 = vpop.permute.xlu0 %2016  ;;  %v2022_v47 = vrot.slane %v1917_v41, 7 }
0x1812   :  { %v2019_v45 = vmul.f32 %v2983_v22, %v2017_v44 }
0x1813   :  { %v2123_v46 = vsel %vm943_vm8, %v2122_v43, %v2121_v42 }
0x1814   :  { %2124 = vrot.lane.b32.xlu0 %v2123_v46, %s3189_s4  ;;  %2047 = vrot.lane.b32.xlu1 %v2019_v45, %s3189_s4 }
0x1818   :  { %2025 = vrot.lane.b32.xlu0 %v2022_v47, %s3189_s4  ;;  %2023 = vrot.lane.b32.xlu1 %v1916_v40, %s3189_s4 }
0x181c   :  { %2034 = vrot.lane.b32.xlu1 %v2019_v45, %s3181_s11 }
0x1886   :  { %v2125_v48 = vpop.permute.xlu0 %2124  ;;  %v2048_v49 = vpop.permute.xlu1 %2047 }
0x1887   :  { %2712 = vmatmul.mubr.msk.f32.vlgmr.msra.gmra.mrb[12].mxu1 %vm812_vm9, %v2125_v48  ;;  %2701 = vmatmul.mubr.msk.f32.vlgmr.msra.gmra.mrb[12].mxu0 %vm812_vm9, %v2048_v49 }
0x1888   :  { %2722 = vmatprep.mubr.msk.f32.mxu0 %vm3188_vm7, %v3186_v0  ;;  %2733 = vmatprep.mubr.msk.f32.mxu1 %vm3188_vm7, %v3186_v0  ;;  %v2209_v0 = vld [vmem:[%s3722_s12 + $0x10] sm:$0xff] }
0x1889   :  { %2817 = vmatpush3.bf16.msra.mxu0 %v2816_v57  ;;  %v2819_v59 = vpack.c.bf16 %v2210_v58, %v2209_v0  ;;  %2823 = vmatpush3.bf16.msra.mxu1 %v2822_v62 }
0x188a   :  { %v2026_v50 = vpop.permute.xlu0 %2025  ;;  %v2024_v52 = vpop.permute.xlu1 %2023  ;;  %2818 = vmatprep.subr.bf16.mxu0 %v3187_v51  ;;  %2824 = vmatprep.subr.bf16.mxu1 %v3187_v51  ;;  %v2462_v51 = vld [vmem:[#allocation12] ss:$0 sm:$0xff] }
0x188b   :  { %2032 = vst.msk [vmem:[#allocation16 + $0x1] sm:$0x1] %vm2031_vm10, %v2026_v50 }
0x188c   :  { %2030 = vst.msk [vmem:[#allocation16 - $0x7] sm:$0x80] %vm2029_vm11, %v2024_v52 }
0x188d   :  { %2820 = vmatpush3.bf16.msra.mxu0 %v2819_v59  ;;  %2826 = vmatpush3.bf16.msra.mxu1 %v2825_v9 }
0x188e   :  { %v2035_v53 = vpop.permute.xlu1 %2034 }
0x188f   :  { %2038 = vst.msk [vmem:[#allocation16] sm:$0x3] %vm2037_vm12, %v2035_v53 }
0x195a   :  { %v2194_v1 = vpop.f32.mrb[12].mxu1  ;;  %v2117_v2 = vpop.f32.mrb[12].mxu0 }
0x195b   :  { %v2195_v18 = vadd.f32 %v2194_v1, %v2117_v2  ;;  %v2713_v3 = vpop.f32.mrb[13].mxu1  ;;  %v2702_v4 = vpop.f32.mrb[13].mxu0 }
0x195d   :  { %v2205_v5 = vadd.f32 %v2461_v16, %v2195_v18 }
0x195f   :  { %v2206_v6 = vmax.f32 %v2205_v5, 0.0 }
0x1961   :  { %2723 = vmatmul.mubr.msk.f32.vlgmr.msra.gmra.mrb[14].mxu0 %vm812_vm9, %v2206_v6 }
0x1a34   :  { %v2287_v11 = vpop.f32.mrb[14].mxu0 }
0x1a35   :  { %v2288_v12 = vadd.f32 %v2462_v51, %v2287_v11  ;;  %v2724_v13 = vpop.f32.mrb[15].mxu0 }
0x1a37   :  { %v2291_v14 = vmax.f32 %v2288_v12, 0.0 }
0x1a39   :  { %2734 = vmatmul.mubr.msk.f32.vlgmr.msra.gmra.mrb[14].mxu1 %vm812_vm9, %v2291_v14 }
0x1a3a   :  { %3133 = shalt.err (!%p3130_p10)
}
0x1a3b   :  { %s3134_s29 = scalar_lea.hbm %s3727_s17, 32 }
0x1a3c   :  { %p3135_p11 = scmp.ne.s32.totalorder %s3727_s17, %s3134_s29  ;;  %p3138_p12 = scmp.lt.u32.totalorder %s3134_s29, %s3727_s17 }
0x1a3e   :  { %p3140_p13 = pnand %p3138_p12, %p3135_p11 }
0x1a40   :  { %3143 = shalt.err (!%p3140_p13)
}
0x1a41   :  { %2396 = dma.vmem_to_hbm [thread:$0]  %s2394_s2, 32, %s3727_s17, [#allocation17]   ;;  %v2464_v15 = vld [vmem:[#allocation13] ss:$0 sm:$0xff] }
0x1a42   :  { %s3192_s24 = smov [#allocation15]  }
0x1a43   :  { %s2383_s10 = sshll.u32 %s3192_s24, 4  ;;  %s2384_s10 = int_to_ptr.vmem [resolvable:$true] %s2383_s10 }
0x1a44   :  { %s3144_s11 = scalar_lea.vmem %s2384_s10, 32  ;;  %p3149_p1 = scmp.lt.s32.totalorder %s2384_s10, %s2384_s10 }
0x1a45   :  { %p3145_p0 = scmp.ne.s32.totalorder %s2384_s10, %s3144_s11  ;;  %p3150_p2 = scmp.lt.s32.totalorder %s3144_s11, %s3144_s11 }
0x1a47   :  { %p3151_p3 = por %p3150_p2, %p3149_p1 }
0x1a49   :  { %p3152_p4 = pnand %p3151_p3, %p3145_p0 }
0x1b0c   :  { %v2372_v17 = vpop.f32.mrb[14].mxu1 }
0x1b0d   :  { %v2373_v19 = vadd.f32 %v2464_v15, %v2372_v17  ;;  %v2735_v20 = vpop.f32.mrb[15].mxu1 }
0x1b0f   :  { %2376 = vst.msk [vmem:[#allocation15] sm:$0x3] %vm131_vm1, %v2373_v19 }
0x1b10   :  { %3155 = shalt.err (!%p3152_p4)
}
0x1b11   :  { %s3156_s17 = scalar_lea.hbm %s3726_s16, 32 }
0x1b12   :  { %p3157_p5 = scmp.ne.s32.totalorder %s3726_s16, %s3156_s17  ;;  %p3160_p6 = scmp.lt.u32.totalorder %s3156_s17, %s3726_s16 }
0x1b14   :  { %p3162_p7 = pnand %p3160_p6, %p3157_p5 }
0x1b16   :  { %3165 = shalt.err (!%p3162_p7)
}
0x1b17   :  { %2386 = dma.vmem_to_hbm [thread:$0]  %s2384_s10, 32, %s3726_s16, [#allocation6]  }
0x1b18   :  { %3174 = dma.done.wait [#allocation6], 32  }
0x1b19   :  { %3175 = vsyncadd [#allocation6], 4294967264 }
0x1b1a   :  { %3176 = dma.done.wait [#allocation17], 32  }
0x1b1b   :  { %3177 = vsyncadd [#allocation17], 4294967264 }
0x1b1c   :  { %2403 = vsyncpa [#allocation5], 1 }
0x1b1d   :  { %2404 = vsyncpa [#allocation8], 1 }
0x1b1e   :  { %2405 = vsyncpa [#allocation11], 1 }
0x1b1f   :  { %2406 = vsyncpa [#allocation14], 1 }
0x1b20   :  { %2407 = vsyncpa [#allocation6], 1 }
0x1b21   :  { %2408 = vsyncpa [#allocation17], 1 }

</bundles_post_ra>
